<compile_context>
chip_gen: v6e
topology: v6e:2x2x1
jax: 0.10.0
libtpu: 0.0.40
codegen_flags: <defaults>
</compile_context>

<pallas_src>
import math
import jax
import jax.numpy as jnp
from jax import lax
from jax.experimental import pallas as pl
from jax.experimental.pallas import tpu as pltpu

EPS = 0.01  # concentration threshold from PSRUCell


def _round_up(x, m):
    return ((x + m - 1) // m) * m


# --------------------------------------------------------------------------
# Kernel 1: purpose-fused PSRU recurrence (grid tiled over batch).
# --------------------------------------------------------------------------
def make_psru_kernel(S, tB, D, P, PDp, Gp):
    def kernel(x_ref, cf_ref, wih_ref, whh_ref, bih_ref, bhh_ref, cexp_ref,
               hn_ref, gi_ref, cfe_ref):
        # Stacked input-side gate projection for ALL timesteps: one fat MXU push instead
        # of S skinny ones; result parked in VMEM scratch, sliced per step below.
        xs = x_ref[...].reshape(S * tB, D)
        gi_ref[...] = (jnp.dot(xs, wih_ref[...], preferred_element_type=jnp.float32)
                       + bih_ref[...])

        # Lane-expand the compact (.., P) concentration factors to the (.., PDp) hidden
        # layout via one small matmul against a 0/1 purpose->lane map (pad lanes stay 0,
        # so the padded hidden lanes remain exactly zero).
        cfs = cf_ref[...].reshape(S * tB, P)
        cfe_ref[...] = jnp.dot(cfs, cexp_ref[...], preferred_element_type=jnp.float32)

        whh = whh_ref[...]          # (PDp, 3*PDp) block-diagonal hidden-side weights
        bhh = bhh_ref[...]          # (1, 3*PDp)

        def step(h, row):
            gi_t = gi_ref[pl.ds(row, tB), :]          # (tB, Gp) from VMEM scratch
            cfe_t = cfe_ref[pl.ds(row, tB), :]        # (tB, PDp)
            gh = jnp.dot(h, whh, preferred_element_type=jnp.float32) + bhh
            i_r, i_i, i_n = gi_t[:, :PDp], gi_t[:, PDp:2 * PDp], gi_t[:, 2 * PDp:]
            h_r, h_i, h_n = gh[:, :PDp], gh[:, PDp:2 * PDp], gh[:, 2 * PDp:]
            resetgate = jax.nn.sigmoid(i_r + h_r)
            inputgate = jax.nn.sigmoid(i_i + h_i)
            newgate = jnp.tanh(i_n + resetgate * h_n)
            return h - (cfe_t * inputgate) * (h - newgate)

        h = jnp.zeros((tB, PDp), jnp.float32)
        if S <= 32:
            # Short sequences: static unroll (per-step ref reads keep live ranges small).
            for t in range(S):
                h = step(h, t * tB)
        else:
            # Production-length sequences: bounded code size / live ranges via fori_loop.
            h = lax.fori_loop(0, S, lambda t, hh: step(hh, pl.multiple_of(t * tB, tB)), h)
        hn_ref[...] = h

    return kernel


# --------------------------------------------------------------------------
# Kernel 2: target-side purpose softmax + per-purpose NT matmuls accumulated
# into the output (grid tiled over batch tiles x target tiles).
# --------------------------------------------------------------------------
def make_score_kernel(P, D):
    nt_dims = (((1,), (1,)), ((), ()))   # contract last dims: A @ B^T

    def kernel(hn_ref, pos_ref, pemb_ref, out_ref):
        pos = pos_ref[...]                                        # (tT, D) bf16 rows
        # Target-side purpose softmax, lane-major over targets: (P, tT)
        tc = lax.dot_general(pemb_ref[...], pos, nt_dims,
                             preferred_element_type=jnp.float32)
        tc = tc - jnp.max(tc, axis=0, keepdims=True)
        e = jnp.exp(tc)
        w = e / jnp.sum(e, axis=0, keepdims=True)                 # (P, tT)

        hn = hn_ref[...]                                          # (tBs, PDp) f32
        for p in range(P):
            hp = hn[:, p * D:(p + 1) * D].astype(pos.dtype)       # (tBs, D) bf16
            sp = lax.dot_general(hp, pos, nt_dims,
                                 preferred_element_type=jnp.float32)   # (tBs, tT)
            contrib = w[p:p + 1, :] * sp
            if p == 0:
                out_ref[...] = contrib
            else:
                out_ref[...] += contrib

    return kernel


# --------------------------------------------------------------------------
# One-time weight packing (outside the per-forward path).
# --------------------------------------------------------------------------
def prepare_params(params):
    emb = params["emb"].astype(jnp.float32)       # (T, D)
    pemb = params["pemb"].astype(jnp.float32)     # (P, D)
    w_ih, w_hh = params["w_ih"], params["w_hh"]   # (P, 3D, D)
    b_ih, b_hh = params["b_ih"], params["b_hh"]   # (P, 3D)

    T, D = emb.shape
    P = pemb.shape[0]
    PD = P * D
    PDp = _round_up(PD, 128)          # lane-dense hidden width
    Gp = 3 * PDp                      # lane-dense fused gate width

    # Column layout: [r | i | n] sections of width PDp; purpose p occupies p*D:(p+1)*D,
    # lanes PD:PDp are zero padding (kept exactly zero through the recurrence).
    wih = jnp.zeros((D, Gp), jnp.float32)
    whh = jnp.zeros((PDp, Gp), jnp.float32)
    bih = jnp.zeros((Gp,), jnp.float32)
    bhh = jnp.zeros((Gp,), jnp.float32)
    for g in range(3):
        for p in range(P):
            c0 = g * PDp + p * D
            wih = wih.at[:, c0:c0 + D].set(
                jnp.transpose(w_ih[p, g * D:(g + 1) * D, :]).astype(jnp.float32))
            whh = whh.at[p * D:(p + 1) * D, c0:c0 + D].set(
                jnp.transpose(w_hh[p, g * D:(g + 1) * D, :]).astype(jnp.float32))
            bih = bih.at[c0:c0 + D].set(b_ih[p, g * D:(g + 1) * D].astype(jnp.float32))
            bhh = bhh.at[c0:c0 + D].set(b_hh[p, g * D:(g + 1) * D].astype(jnp.float32))
    # TODO(synk): at production P*D >> 256 the block-diagonal fusion wastes (1-1/P) of the
    # hidden-matmul MACs; switch to per-purpose pushes / sublane-stacked layout there.

    # 0/1 purpose -> hidden-lane expansion map used in-kernel to broadcast cf.
    lane = jnp.arange(PDp)
    cexp = (((lane[None, :] // D) == jnp.arange(P)[:, None]) & (lane[None, :] < PD))
    cexp = cexp.astype(jnp.float32)                               # (P, PDp)

    # Item table for the score kernel: row-major, rows padded to a multiple of the target
    # tile, cast to bf16 (f32 accumulation in-kernel) to halve HBM traffic.
    if T <= 4096:
        T_pad = _round_up(T, 128)
        tT = T_pad
    else:
        tT = 4096
        T_pad = _round_up(T, tT)
    emb_score = jnp.pad(emb, ((0, T_pad - T), (0, 0))).astype(jnp.bfloat16)

    return dict(emb=emb, pemb=pemb, pemb_bf16=pemb.astype(jnp.bfloat16),
                wih=wih, whh=whh, bih=bih[None, :], bhh=bhh[None, :], cexp=cexp,
                emb_score=emb_score,
                D=D, P=P, T=T, PD=PD, PDp=PDp, Gp=Gp, T_pad=T_pad, tT=tT)


# --------------------------------------------------------------------------
# Forward pass (embedding gather + concen softmax in XLA, kernels for the rest).
# --------------------------------------------------------------------------
def mcprn_forward(seq, packed, tau):
    """seq: (seq_len, batch) int32 — same convention as the PyTorch module input."""
    D, P = packed["D"], packed["P"]
    PDp, Gp = packed["PDp"], packed["Gp"]
    T, T_pad, tT = packed["T"], packed["T_pad"], packed["tT"]
    S, B = seq.shape

    # ----- batch tiling: pad batch to a multiple of 8 (alignment + remainder safety) ---
    B8 = _round_up(max(B, 8), 8)
    if B8 <= 256:
        tB = B8              # one fat tile: best for the latency-bound recurrence
    elif B8 < 512:
        tB = 128             # >=2 grid steps (v5e MXU M=128 / v7x 2-TC sharding)
    else:
        tB = 256             # fat tiles for v6e, still >=2 grid steps
    # TODO(synk): on v7x prefer tB <= B8//2 so the "parallel" batch axis shards across
    # both TensorCores even for small batches.
    B_pad = _round_up(B8, tB)
    seq_p = jnp.pad(seq, ((0, 0), (0, B_pad - B)))                # pad idx 0 -> mask 0

    # ----- embedding gather (time-major, no transpose) + masked/thresholded concen -----
    x = packed["emb"][seq_p]                                      # (S, B_pad, D) f32
    mask = (seq_p != 0).astype(jnp.float32)                       # (S, B_pad)
    cs = jnp.einsum("sbd,pd->sbp", x, packed["pemb"]) / tau
    cwm = mask[..., None] * jax.nn.softmax(cs, axis=-1)
    cf = jnp.where(cwm >= EPS, cwm, 0.0)                          # compact (S, B_pad, P)

    # ----- PSRU recurrence kernel -------------------------------------------------------
    psru = pl.pallas_call(
        make_psru_kernel(S, tB, D, P, PDp, Gp),
        out_shape=jax.ShapeDtypeStruct((B_pad, PDp), jnp.float32),
        grid_spec=pltpu.PrefetchScalarGridSpec(
            num_scalar_prefetch=0,
            grid=(B_pad // tB,),
            in_specs=[
                pl.BlockSpec((S, tB, D), lambda i: (0, i, 0)),    # seq embeddings
                pl.BlockSpec((S, tB, P), lambda i: (0, i, 0)),    # compact concen factors
                pl.BlockSpec((D, Gp), lambda i: (0, 0)),          # fused input weights
                pl.BlockSpec((PDp, Gp), lambda i: (0, 0)),        # block-diag hidden wts
                pl.BlockSpec((1, Gp), lambda i: (0, 0)),          # input biases
                pl.BlockSpec((1, Gp), lambda i: (0, 0)),          # hidden biases
                pl.BlockSpec((P, PDp), lambda i: (0, 0)),         # purpose->lane map
            ],
            out_specs=pl.BlockSpec((tB, PDp), lambda i: (i, 0)),
            scratch_shapes=[
                pltpu.VMEM((S * tB, Gp), jnp.float32),            # stacked gi
                pltpu.VMEM((S * tB, PDp), jnp.float32),           # lane-expanded cf
            ],
        ),
        compiler_params=pltpu.CompilerParams(
            dimension_semantics=("parallel",),
            vmem_limit_bytes=48 * 1024 * 1024,   # above 16/32 MiB defaults, < v7x 64 MiB
        ),
    )
    hn = psru(x, cf, packed["wih"], packed["whh"], packed["bih"], packed["bhh"],
              packed["cexp"])                                     # (B_pad, PDp)

    # ----- score kernel: lane-dense target tiles of the row-major bf16 item table ------
    tBs = B_pad if B_pad <= 256 else 128
    # TODO(synk): on v7x consider pipeline_mode=pl.Buffered(3) on the item-table spec if
    # the streaming DMA is still exposed at 3.2 TB/s HBM.
    score = pl.pallas_call(
        make_score_kernel(P, D),
        out_shape=jax.ShapeDtypeStruct((B_pad, T_pad), jnp.float32),
        grid_spec=pltpu.PrefetchScalarGridSpec(
            num_scalar_prefetch=0,
            grid=(B_pad // tBs, T_pad // tT),
            in_specs=[
                pl.BlockSpec((tBs, PDp), lambda i, j: (i, 0)),
                pl.BlockSpec((tT, D), lambda i, j: (j, 0)),
                pl.BlockSpec((P, D), lambda i, j: (0, 0)),
            ],
            out_specs=pl.BlockSpec((tBs, tT), lambda i, j: (i, j)),
        ),
        compiler_params=pltpu.CompilerParams(
            dimension_semantics=("parallel", "parallel")),
    )
    scores = score(hn, packed["emb_score"], packed["pemb_bf16"])
    return scores[:B, :T]


# --------------------------------------------------------------------------
# Pure-JAX reference (mirrors the PyTorch forward) for a correctness check.
# --------------------------------------------------------------------------
def mcprn_ref(seq, params, tau):
    emb, pemb = params["emb"], params["pemb"]
    w_ih, w_hh, b_ih, b_hh = params["w_ih"], params["w_hh"], params["b_ih"], params["b_hh"]
    T, D = emb.shape
    P = pemb.shape[0]
    seq_bt = seq.T
    B, S = seq_bt.shape
    mask = (seq_bt != 0).astype(jnp.float32)
    x = emb[seq_bt]                                            # (B, S, D)
    cs = jnp.einsum("bsd,pd->bsp", x, pemb) / tau
    cw = jax.nn.softmax(cs, axis=2)
    cwr = mask[..., None] * cw
    hn_list = []
    for p in range(P):
        h = jnp.zeros((B, D), jnp.float32)
        for t in range(S):
            xt = x[:, t, :]
            gi = xt @ w_ih[p].T + b_ih[p]
            gh = h @ w_hh[p].T + b_hh[p]
            i_r, i_i, i_n = jnp.split(gi, 3, axis=1)
            h_r, h_i, h_n = jnp.split(gh, 3, axis=1)
            rg = jax.nn.sigmoid(i_r + h_r)
            ig = jax.nn.sigmoid(i_i + h_i)
            ng = jnp.tanh(i_n + rg * h_n)
            c = cwr[:, t, p]
            cfac = jnp.where(c >= EPS, c, 0.0)[:, None]
            h = h - cfac * ig * (h - ng)
        hn_list.append(h)
    hn = jnp.stack(hn_list)                                    # (P, B, D)
    pos = emb                                                  # target = arange(n_items)
    tw = jax.nn.softmax(pos @ pemb.T, axis=1)                  # (T, P)
    ctx = jnp.einsum("pbd,tp->btd", hn, tw)
    return jnp.einsum("btd,td->bt", ctx, pos)


def init_params(key, n_items_total, D, P):
    stdv = 1.0 / math.sqrt(D)
    ks = jax.random.split(key, 6)
    u = lambda k, shape: jax.random.uniform(k, shape, jnp.float32, -stdv, stdv)
    return {
        "emb": u(ks[0], (n_items_total, D)),     # reset_parameters overwrites padding row
        "pemb": u(ks[1], (P, D)),
        "w_ih": u(ks[2], (P, 3 * D, D)),
        "w_hh": u(ks[3], (P, 3 * D, D)),
        "b_ih": u(ks[4], (P, 3 * D)),
        "b_hh": u(ks[5], (P, 3 * D)),
    }


if __name__ == "__main__":
    key = jax.random.PRNGKey(0)
    n_items = 255                       # -> item table size 256
    D, P, B, S, tau = 32, 3, 4, 8, 0.5
    n_items_total = n_items + 1

    kp, ks = jax.random.split(key)
    params = init_params(kp, n_items_total, D, P)
    seq = jax.random.randint(ks, (S, B), 0, n_items_total, dtype=jnp.int32)
    seq = seq.at[0, 0].set(0).at[3, 2].set(0)   # some padding positions

    packed = prepare_params(params)             # one-time weight packing
    scores = jax.block_until_ready(mcprn_forward(seq, packed, tau))
    assert scores.shape == (B, n_items_total)

    ref = mcprn_ref(seq, params, tau)
    err = float(jnp.max(jnp.abs(scores - ref)))
    # score path uses a bf16 item table (f32 accumulation) -> slightly looser tolerance
    assert err < 2e-3, f"mismatch vs reference: {err}"

    print("KERNEL_OK")
</pallas_src>

<mosaic_0001>
module attributes {stable_mosaic.version = 11 : i64} {
  func.func @kernel(%arg0: i32, %arg1: memref<8x8x32xf32, #tpu.memory_space<vmem>>, %arg2: memref<8x8x3xf32, #tpu.memory_space<vmem>>, %arg3: memref<32x384xf32, #tpu.memory_space<vmem>>, %arg4: memref<128x384xf32, #tpu.memory_space<vmem>>, %arg5: memref<1x384xf32, #tpu.memory_space<vmem>>, %arg6: memref<1x384xf32, #tpu.memory_space<vmem>>, %arg7: memref<3x128xf32, #tpu.memory_space<vmem>>, %arg8: memref<8x128xf32, #tpu.memory_space<vmem>>, %arg9: memref<64x384xf32, #tpu.memory_space<vmem>>, %arg10: memref<64x128xf32, #tpu.memory_space<vmem>>) attributes {dimension_semantics = [#tpu.dimension_semantics<parallel>], iteration_bounds = array<i64: 1>, scalar_prefetch = 0 : i64, scratch_operands = 2 : i64, tpu.core_type = #tpu.core_type<tc>, window_params = [{transform_indices = @transform_0, window_bounds = array<i64: 8, 8, 32>}, {transform_indices = @transform_1, window_bounds = array<i64: 8, 8, 3>}, {pipeline_mode = #tpu.pipeline_mode<synchronous>, transform_indices = @transform_2, window_bounds = array<i64: 32, 384>}, {pipeline_mode = #tpu.pipeline_mode<synchronous>, transform_indices = @transform_3, window_bounds = array<i64: 128, 384>}, {pipeline_mode = #tpu.pipeline_mode<synchronous>, transform_indices = @transform_4, window_bounds = array<i64: 1, 384>}, {pipeline_mode = #tpu.pipeline_mode<synchronous>, transform_indices = @transform_5, window_bounds = array<i64: 1, 384>}, {pipeline_mode = #tpu.pipeline_mode<synchronous>, transform_indices = @transform_6, window_bounds = array<i64: 3, 128>}, {transform_indices = @transform_7, window_bounds = array<i64: 8, 128>}]} {
    %c0 = arith.constant 0 : index
    %c0_0 = arith.constant 0 : index
    %c0_1 = arith.constant 0 : index
    %0 = vector.load %arg1[%c0, %c0_0, %c0_1] : memref<8x8x32xf32, #tpu.memory_space<vmem>>, vector<8x8x32xf32>
    %1 = vector.shape_cast %0 : vector<8x8x32xf32> to vector<64x32xf32>
    %c0_2 = arith.constant 0 : index
    %c0_3 = arith.constant 0 : index
    %2 = vector.load %arg3[%c0_2, %c0_3] : memref<32x384xf32, #tpu.memory_space<vmem>>, vector<32x384xf32>
    %cst = arith.constant dense<0.000000e+00> : vector<64x384xf32>
    %3 = tpu.matmul %1, %2, %cst {dimension_numbers = #tpu.dot_dimension_numbers<[1], [0], [0], [1], [0, 0, 1, 1], [], []>} : vector<64x32xf32>, vector<32x384xf32>, vector<64x384xf32> -> vector<64x384xf32>
    %c0_4 = arith.constant 0 : index
    %c0_5 = arith.constant 0 : index
    %4 = vector.load %arg5[%c0_4, %c0_5] : memref<1x384xf32, #tpu.memory_space<vmem>>, vector<1x384xf32>
    %5 = vector.broadcast %4 : vector<1x384xf32> to vector<64x384xf32>
    %6 = arith.addf %3, %5 : vector<64x384xf32>
    %c0_6 = arith.constant 0 : index
    %c0_7 = arith.constant 0 : index
    %7 = vector.load %arg9[%c0_6, %c0_7] : memref<64x384xf32, #tpu.memory_space<vmem>>, vector<64x384xf32>
    tpu.vector_store %arg9[%c0_6, %c0_7], %6 {strides = array<i32>} : memref<64x384xf32, #tpu.memory_space<vmem>>, vector<64x384xf32>,
    %c0_8 = arith.constant 0 : index
    %c0_9 = arith.constant 0 : index
    %c0_10 = arith.constant 0 : index
    %8 = vector.load %arg2[%c0_8, %c0_9, %c0_10] : memref<8x8x3xf32, #tpu.memory_space<vmem>>, vector<8x8x3xf32>
    %9 = vector.shape_cast %8 : vector<8x8x3xf32> to vector<64x3xf32>
    %c0_11 = arith.constant 0 : index
    %c0_12 = arith.constant 0 : index
    %10 = vector.load %arg7[%c0_11, %c0_12] : memref<3x128xf32, #tpu.memory_space<vmem>>, vector<3x128xf32>
    %cst_13 = arith.constant dense<0.000000e+00> : vector<64x128xf32>
    %11 = tpu.matmul %9, %10, %cst_13 {dimension_numbers = #tpu.dot_dimension_numbers<[1], [0], [0], [1], [0, 0, 1, 1], [], []>} : vector<64x3xf32>, vector<3x128xf32>, vector<64x128xf32> -> vector<64x128xf32>
    %c0_14 = arith.constant 0 : index
    %c0_15 = arith.constant 0 : index
    %12 = vector.load %arg10[%c0_14, %c0_15] : memref<64x128xf32, #tpu.memory_space<vmem>>, vector<64x128xf32>
    tpu.vector_store %arg10[%c0_14, %c0_15], %11 {strides = array<i32>} : memref<64x128xf32, #tpu.memory_space<vmem>>, vector<64x128xf32>,
    %c0_16 = arith.constant 0 : index
    %c0_17 = arith.constant 0 : index
    %13 = vector.load %arg4[%c0_16, %c0_17] : memref<128x384xf32, #tpu.memory_space<vmem>>, vector<128x384xf32>
    %c0_18 = arith.constant 0 : index
    %c0_19 = arith.constant 0 : index
    %14 = vector.load %arg6[%c0_18, %c0_19] : memref<1x384xf32, #tpu.memory_space<vmem>>, vector<1x384xf32>
    %cst_20 = arith.constant 0.000000e+00 : f32
    %15 = vector.broadcast %cst_20 : f32 to vector<8x128xf32>
    %c0_21 = arith.constant 0 : index
    %c0_22 = arith.constant 0 : index
    %16 = vector.load %arg9[%c0_21, %c0_22] : memref<64x384xf32, #tpu.memory_space<vmem>>, vector<8x384xf32>
    %c0_23 = arith.constant 0 : index
    %c0_24 = arith.constant 0 : index
    %17 = vector.load %arg10[%c0_23, %c0_24] : memref<64x128xf32, #tpu.memory_space<vmem>>, vector<8x128xf32>
    %cst_25 = arith.constant dense<0.000000e+00> : vector<8x384xf32>
    %18 = tpu.matmul %15, %13, %cst_25 {dimension_numbers = #tpu.dot_dimension_numbers<[1], [0], [0], [1], [0, 0, 1, 1], [], []>} : vector<8x128xf32>, vector<128x384xf32>, vector<8x384xf32> -> vector<8x384xf32>
    %19 = vector.broadcast %14 : vector<1x384xf32> to vector<8x384xf32>
    %20 = arith.addf %18, %19 : vector<8x384xf32>
    %21 = vector.extract_strided_slice %16 {offsets = [0, 0], sizes = [8, 128], strides = [1, 1]} : vector<8x384xf32> to vector<8x128xf32>
    %22 = vector.extract_strided_slice %16 {offsets = [0, 128], sizes = [8, 128], strides = [1, 1]} : vector<8x384xf32> to vector<8x128xf32>
    %23 = vector.extract_strided_slice %16 {offsets = [0, 256], sizes = [8, 128], strides = [1, 1]} : vector<8x384xf32> to vector<8x128xf32>
    %24 = vector.extract_strided_slice %20 {offsets = [0, 0], sizes = [8, 128], strides = [1, 1]} : vector<8x384xf32> to vector<8x128xf32>
    %25 = vector.extract_strided_slice %20 {offsets = [0, 128], sizes = [8, 128], strides = [1, 1]} : vector<8x384xf32> to vector<8x128xf32>
    %26 = vector.extract_strided_slice %20 {offsets = [0, 256], sizes = [8, 128], strides = [1, 1]} : vector<8x384xf32> to vector<8x128xf32>
    %27 = arith.addf %21, %24 : vector<8x128xf32>
    %28 = arith.negf %27 : vector<8x128xf32>
    %29 = math.exp %28 : vector<8x128xf32>
    %cst_26 = arith.constant 1.000000e+00 : f32
    %30 = vector.broadcast %cst_26 : f32 to vector<8x128xf32>
    %31 = arith.addf %30, %29 : vector<8x128xf32>
    %32 = arith.divf %30, %31 : vector<8x128xf32>
    %33 = arith.addf %22, %25 : vector<8x128xf32>
    %34 = arith.negf %33 : vector<8x128xf32>
    %35 = math.exp %34 : vector<8x128xf32>
    %cst_27 = arith.constant 1.000000e+00 : f32
    %36 = vector.broadcast %cst_27 : f32 to vector<8x128xf32>
    %37 = arith.addf %36, %35 : vector<8x128xf32>
    %38 = arith.divf %36, %37 : vector<8x128xf32>
    %39 = arith.mulf %32, %26 : vector<8x128xf32>
    %40 = arith.addf %23, %39 : vector<8x128xf32>
    %41 = math.tanh %40 : vector<8x128xf32>
    %42 = arith.mulf %17, %38 : vector<8x128xf32>
    %43 = arith.subf %15, %41 : vector<8x128xf32>
    %44 = arith.mulf %42, %43 : vector<8x128xf32>
    %45 = arith.subf %15, %44 : vector<8x128xf32>
    %c8 = arith.constant 8 : index
    %c0_28 = arith.constant 0 : index
    %46 = vector.load %arg9[%c8, %c0_28] : memref<64x384xf32, #tpu.memory_space<vmem>>, vector<8x384xf32>
    %c8_29 = arith.constant 8 : index
    %c0_30 = arith.constant 0 : index
    %47 = vector.load %arg10[%c8_29, %c0_30] : memref<64x128xf32, #tpu.memory_space<vmem>>, vector<8x128xf32>
    %cst_31 = arith.constant dense<0.000000e+00> : vector<8x384xf32>
    %48 = tpu.matmul %45, %13, %cst_31 {dimension_numbers = #tpu.dot_dimension_numbers<[1], [0], [0], [1], [0, 0, 1, 1], [], []>} : vector<8x128xf32>, vector<128x384xf32>, vector<8x384xf32> -> vector<8x384xf32>
    %49 = vector.broadcast %14 : vector<1x384xf32> to vector<8x384xf32>
    %50 = arith.addf %48, %49 : vector<8x384xf32>
    %51 = vector.extract_strided_slice %46 {offsets = [0, 0], sizes = [8, 128], strides = [1, 1]} : vector<8x384xf32> to vector<8x128xf32>
    %52 = vector.extract_strided_slice %46 {offsets = [0, 128], sizes = [8, 128], strides = [1, 1]} : vector<8x384xf32> to vector<8x128xf32>
    %53 = vector.extract_strided_slice %46 {offsets = [0, 256], sizes = [8, 128], strides = [1, 1]} : vector<8x384xf32> to vector<8x128xf32>
    %54 = vector.extract_strided_slice %50 {offsets = [0, 0], sizes = [8, 128], strides = [1, 1]} : vector<8x384xf32> to vector<8x128xf32>
    %55 = vector.extract_strided_slice %50 {offsets = [0, 128], sizes = [8, 128], strides = [1, 1]} : vector<8x384xf32> to vector<8x128xf32>
    %56 = vector.extract_strided_slice %50 {offsets = [0, 256], sizes = [8, 128], strides = [1, 1]} : vector<8x384xf32> to vector<8x128xf32>
    %57 = arith.addf %51, %54 : vector<8x128xf32>
    %58 = arith.negf %57 : vector<8x128xf32>
    %59 = math.exp %58 : vector<8x128xf32>
    %cst_32 = arith.constant 1.000000e+00 : f32
    %60 = vector.broadcast %cst_32 : f32 to vector<8x128xf32>
    %61 = arith.addf %60, %59 : vector<8x128xf32>
    %62 = arith.divf %60, %61 : vector<8x128xf32>
    %63 = arith.addf %52, %55 : vector<8x128xf32>
    %64 = arith.negf %63 : vector<8x128xf32>
    %65 = math.exp %64 : vector<8x128xf32>
    %cst_33 = arith.constant 1.000000e+00 : f32
    %66 = vector.broadcast %cst_33 : f32 to vector<8x128xf32>
    %67 = arith.addf %66, %65 : vector<8x128xf32>
    %68 = arith.divf %66, %67 : vector<8x128xf32>
    %69 = arith.mulf %62, %56 : vector<8x128xf32>
    %70 = arith.addf %53, %69 : vector<8x128xf32>
    %71 = math.tanh %70 : vector<8x128xf32>
    %72 = arith.mulf %47, %68 : vector<8x128xf32>
    %73 = arith.subf %45, %71 : vector<8x128xf32>
    %74 = arith.mulf %72, %73 : vector<8x128xf32>
    %75 = arith.subf %45, %74 : vector<8x128xf32>
    %c16 = arith.constant 16 : index
    %c0_34 = arith.constant 0 : index
    %76 = vector.load %arg9[%c16, %c0_34] : memref<64x384xf32, #tpu.memory_space<vmem>>, vector<8x384xf32>
    %c16_35 = arith.constant 16 : index
    %c0_36 = arith.constant 0 : index
    %77 = vector.load %arg10[%c16_35, %c0_36] : memref<64x128xf32, #tpu.memory_space<vmem>>, vector<8x128xf32>
    %cst_37 = arith.constant dense<0.000000e+00> : vector<8x384xf32>
    %78 = tpu.matmul %75, %13, %cst_37 {dimension_numbers = #tpu.dot_dimension_numbers<[1], [0], [0], [1], [0, 0, 1, 1], [], []>} : vector<8x128xf32>, vector<128x384xf32>, vector<8x384xf32> -> vector<8x384xf32>
    %79 = vector.broadcast %14 : vector<1x384xf32> to vector<8x384xf32>
    %80 = arith.addf %78, %79 : vector<8x384xf32>
    %81 = vector.extract_strided_slice %76 {offsets = [0, 0], sizes = [8, 128], strides = [1, 1]} : vector<8x384xf32> to vector<8x128xf32>
    %82 = vector.extract_strided_slice %76 {offsets = [0, 128], sizes = [8, 128], strides = [1, 1]} : vector<8x384xf32> to vector<8x128xf32>
    %83 = vector.extract_strided_slice %76 {offsets = [0, 256], sizes = [8, 128], strides = [1, 1]} : vector<8x384xf32> to vector<8x128xf32>
    %84 = vector.extract_strided_slice %80 {offsets = [0, 0], sizes = [8, 128], strides = [1, 1]} : vector<8x384xf32> to vector<8x128xf32>
    %85 = vector.extract_strided_slice %80 {offsets = [0, 128], sizes = [8, 128], strides = [1, 1]} : vector<8x384xf32> to vector<8x128xf32>
    %86 = vector.extract_strided_slice %80 {offsets = [0, 256], sizes = [8, 128], strides = [1, 1]} : vector<8x384xf32> to vector<8x128xf32>
    %87 = arith.addf %81, %84 : vector<8x128xf32>
    %88 = arith.negf %87 : vector<8x128xf32>
    %89 = math.exp %88 : vector<8x128xf32>
    %cst_38 = arith.constant 1.000000e+00 : f32
    %90 = vector.broadcast %cst_38 : f32 to vector<8x128xf32>
    %91 = arith.addf %90, %89 : vector<8x128xf32>
    %92 = arith.divf %90, %91 : vector<8x128xf32>
    %93 = arith.addf %82, %85 : vector<8x128xf32>
    %94 = arith.negf %93 : vector<8x128xf32>
    %95 = math.exp %94 : vector<8x128xf32>
    %cst_39 = arith.constant 1.000000e+00 : f32
    %96 = vector.broadcast %cst_39 : f32 to vector<8x128xf32>
    %97 = arith.addf %96, %95 : vector<8x128xf32>
    %98 = arith.divf %96, %97 : vector<8x128xf32>
    %99 = arith.mulf %92, %86 : vector<8x128xf32>
    %100 = arith.addf %83, %99 : vector<8x128xf32>
    %101 = math.tanh %100 : vector<8x128xf32>
    %102 = arith.mulf %77, %98 : vector<8x128xf32>
    %103 = arith.subf %75, %101 : vector<8x128xf32>
    %104 = arith.mulf %102, %103 : vector<8x128xf32>
    %105 = arith.subf %75, %104 : vector<8x128xf32>
    %c24 = arith.constant 24 : index
    %c0_40 = arith.constant 0 : index
    %106 = vector.load %arg9[%c24, %c0_40] : memref<64x384xf32, #tpu.memory_space<vmem>>, vector<8x384xf32>
    %c24_41 = arith.constant 24 : index
    %c0_42 = arith.constant 0 : index
    %107 = vector.load %arg10[%c24_41, %c0_42] : memref<64x128xf32, #tpu.memory_space<vmem>>, vector<8x128xf32>
    %cst_43 = arith.constant dense<0.000000e+00> : vector<8x384xf32>
    %108 = tpu.matmul %105, %13, %cst_43 {dimension_numbers = #tpu.dot_dimension_numbers<[1], [0], [0], [1], [0, 0, 1, 1], [], []>} : vector<8x128xf32>, vector<128x384xf32>, vector<8x384xf32> -> vector<8x384xf32>
    %109 = vector.broadcast %14 : vector<1x384xf32> to vector<8x384xf32>
    %110 = arith.addf %108, %109 : vector<8x384xf32>
    %111 = vector.extract_strided_slice %106 {offsets = [0, 0], sizes = [8, 128], strides = [1, 1]} : vector<8x384xf32> to vector<8x128xf32>
    %112 = vector.extract_strided_slice %106 {offsets = [0, 128], sizes = [8, 128], strides = [1, 1]} : vector<8x384xf32> to vector<8x128xf32>
    %113 = vector.extract_strided_slice %106 {offsets = [0, 256], sizes = [8, 128], strides = [1, 1]} : vector<8x384xf32> to vector<8x128xf32>
    %114 = vector.extract_strided_slice %110 {offsets = [0, 0], sizes = [8, 128], strides = [1, 1]} : vector<8x384xf32> to vector<8x128xf32>
    %115 = vector.extract_strided_slice %110 {offsets = [0, 128], sizes = [8, 128], strides = [1, 1]} : vector<8x384xf32> to vector<8x128xf32>
    %116 = vector.extract_strided_slice %110 {offsets = [0, 256], sizes = [8, 128], strides = [1, 1]} : vector<8x384xf32> to vector<8x128xf32>
    %117 = arith.addf %111, %114 : vector<8x128xf32>
    %118 = arith.negf %117 : vector<8x128xf32>
    %119 = math.exp %118 : vector<8x128xf32>
    %cst_44 = arith.constant 1.000000e+00 : f32
    %120 = vector.broadcast %cst_44 : f32 to vector<8x128xf32>
    %121 = arith.addf %120, %119 : vector<8x128xf32>
    %122 = arith.divf %120, %121 : vector<8x128xf32>
    %123 = arith.addf %112, %115 : vector<8x128xf32>
    %124 = arith.negf %123 : vector<8x128xf32>
    %125 = math.exp %124 : vector<8x128xf32>
    %cst_45 = arith.constant 1.000000e+00 : f32
    %126 = vector.broadcast %cst_45 : f32 to vector<8x128xf32>
    %127 = arith.addf %126, %125 : vector<8x128xf32>
    %128 = arith.divf %126, %127 : vector<8x128xf32>
    %129 = arith.mulf %122, %116 : vector<8x128xf32>
    %130 = arith.addf %113, %129 : vector<8x128xf32>
    %131 = math.tanh %130 : vector<8x128xf32>
    %132 = arith.mulf %107, %128 : vector<8x128xf32>
    %133 = arith.subf %105, %131 : vector<8x128xf32>
    %134 = arith.mulf %132, %133 : vector<8x128xf32>
    %135 = arith.subf %105, %134 : vector<8x128xf32>
    %c32 = arith.constant 32 : index
    %c0_46 = arith.constant 0 : index
    %136 = vector.load %arg9[%c32, %c0_46] : memref<64x384xf32, #tpu.memory_space<vmem>>, vector<8x384xf32>
    %c32_47 = arith.constant 32 : index
    %c0_48 = arith.constant 0 : index
    %137 = vector.load %arg10[%c32_47, %c0_48] : memref<64x128xf32, #tpu.memory_space<vmem>>, vector<8x128xf32>
    %cst_49 = arith.constant dense<0.000000e+00> : vector<8x384xf32>
    %138 = tpu.matmul %135, %13, %cst_49 {dimension_numbers = #tpu.dot_dimension_numbers<[1], [0], [0], [1], [0, 0, 1, 1], [], []>} : vector<8x128xf32>, vector<128x384xf32>, vector<8x384xf32> -> vector<8x384xf32>
    %139 = vector.broadcast %14 : vector<1x384xf32> to vector<8x384xf32>
    %140 = arith.addf %138, %139 : vector<8x384xf32>
    %141 = vector.extract_strided_slice %136 {offsets = [0, 0], sizes = [8, 128], strides = [1, 1]} : vector<8x384xf32> to vector<8x128xf32>
    %142 = vector.extract_strided_slice %136 {offsets = [0, 128], sizes = [8, 128], strides = [1, 1]} : vector<8x384xf32> to vector<8x128xf32>
    %143 = vector.extract_strided_slice %136 {offsets = [0, 256], sizes = [8, 128], strides = [1, 1]} : vector<8x384xf32> to vector<8x128xf32>
    %144 = vector.extract_strided_slice %140 {offsets = [0, 0], sizes = [8, 128], strides = [1, 1]} : vector<8x384xf32> to vector<8x128xf32>
    %145 = vector.extract_strided_slice %140 {offsets = [0, 128], sizes = [8, 128], strides = [1, 1]} : vector<8x384xf32> to vector<8x128xf32>
    %146 = vector.extract_strided_slice %140 {offsets = [0, 256], sizes = [8, 128], strides = [1, 1]} : vector<8x384xf32> to vector<8x128xf32>
    %147 = arith.addf %141, %144 : vector<8x128xf32>
    %148 = arith.negf %147 : vector<8x128xf32>
    %149 = math.exp %148 : vector<8x128xf32>
    %cst_50 = arith.constant 1.000000e+00 : f32
    %150 = vector.broadcast %cst_50 : f32 to vector<8x128xf32>
    %151 = arith.addf %150, %149 : vector<8x128xf32>
    %152 = arith.divf %150, %151 : vector<8x128xf32>
    %153 = arith.addf %142, %145 : vector<8x128xf32>
    %154 = arith.negf %153 : vector<8x128xf32>
    %155 = math.exp %154 : vector<8x128xf32>
    %cst_51 = arith.constant 1.000000e+00 : f32
    %156 = vector.broadcast %cst_51 : f32 to vector<8x128xf32>
    %157 = arith.addf %156, %155 : vector<8x128xf32>
    %158 = arith.divf %156, %157 : vector<8x128xf32>
    %159 = arith.mulf %152, %146 : vector<8x128xf32>
    %160 = arith.addf %143, %159 : vector<8x128xf32>
    %161 = math.tanh %160 : vector<8x128xf32>
    %162 = arith.mulf %137, %158 : vector<8x128xf32>
    %163 = arith.subf %135, %161 : vector<8x128xf32>
    %164 = arith.mulf %162, %163 : vector<8x128xf32>
    %165 = arith.subf %135, %164 : vector<8x128xf32>
    %c40 = arith.constant 40 : index
    %c0_52 = arith.constant 0 : index
    %166 = vector.load %arg9[%c40, %c0_52] : memref<64x384xf32, #tpu.memory_space<vmem>>, vector<8x384xf32>
    %c40_53 = arith.constant 40 : index
    %c0_54 = arith.constant 0 : index
    %167 = vector.load %arg10[%c40_53, %c0_54] : memref<64x128xf32, #tpu.memory_space<vmem>>, vector<8x128xf32>
    %cst_55 = arith.constant dense<0.000000e+00> : vector<8x384xf32>
    %168 = tpu.matmul %165, %13, %cst_55 {dimension_numbers = #tpu.dot_dimension_numbers<[1], [0], [0], [1], [0, 0, 1, 1], [], []>} : vector<8x128xf32>, vector<128x384xf32>, vector<8x384xf32> -> vector<8x384xf32>
    %169 = vector.broadcast %14 : vector<1x384xf32> to vector<8x384xf32>
    %170 = arith.addf %168, %169 : vector<8x384xf32>
    %171 = vector.extract_strided_slice %166 {offsets = [0, 0], sizes = [8, 128], strides = [1, 1]} : vector<8x384xf32> to vector<8x128xf32>
    %172 = vector.extract_strided_slice %166 {offsets = [0, 128], sizes = [8, 128], strides = [1, 1]} : vector<8x384xf32> to vector<8x128xf32>
    %173 = vector.extract_strided_slice %166 {offsets = [0, 256], sizes = [8, 128], strides = [1, 1]} : vector<8x384xf32> to vector<8x128xf32>
    %174 = vector.extract_strided_slice %170 {offsets = [0, 0], sizes = [8, 128], strides = [1, 1]} : vector<8x384xf32> to vector<8x128xf32>
    %175 = vector.extract_strided_slice %170 {offsets = [0, 128], sizes = [8, 128], strides = [1, 1]} : vector<8x384xf32> to vector<8x128xf32>
    %176 = vector.extract_strided_slice %170 {offsets = [0, 256], sizes = [8, 128], strides = [1, 1]} : vector<8x384xf32> to vector<8x128xf32>
    %177 = arith.addf %171, %174 : vector<8x128xf32>
    %178 = arith.negf %177 : vector<8x128xf32>
    %179 = math.exp %178 : vector<8x128xf32>
    %cst_56 = arith.constant 1.000000e+00 : f32
    %180 = vector.broadcast %cst_56 : f32 to vector<8x128xf32>
    %181 = arith.addf %180, %179 : vector<8x128xf32>
    %182 = arith.divf %180, %181 : vector<8x128xf32>
    %183 = arith.addf %172, %175 : vector<8x128xf32>
    %184 = arith.negf %183 : vector<8x128xf32>
    %185 = math.exp %184 : vector<8x128xf32>
    %cst_57 = arith.constant 1.000000e+00 : f32
    %186 = vector.broadcast %cst_57 : f32 to vector<8x128xf32>
    %187 = arith.addf %186, %185 : vector<8x128xf32>
    %188 = arith.divf %186, %187 : vector<8x128xf32>
    %189 = arith.mulf %182, %176 : vector<8x128xf32>
    %190 = arith.addf %173, %189 : vector<8x128xf32>
    %191 = math.tanh %190 : vector<8x128xf32>
    %192 = arith.mulf %167, %188 : vector<8x128xf32>
    %193 = arith.subf %165, %191 : vector<8x128xf32>
    %194 = arith.mulf %192, %193 : vector<8x128xf32>
    %195 = arith.subf %165, %194 : vector<8x128xf32>
    %c48 = arith.constant 48 : index
    %c0_58 = arith.constant 0 : index
    %196 = vector.load %arg9[%c48, %c0_58] : memref<64x384xf32, #tpu.memory_space<vmem>>, vector<8x384xf32>
    %c48_59 = arith.constant 48 : index
    %c0_60 = arith.constant 0 : index
    %197 = vector.load %arg10[%c48_59, %c0_60] : memref<64x128xf32, #tpu.memory_space<vmem>>, vector<8x128xf32>
    %cst_61 = arith.constant dense<0.000000e+00> : vector<8x384xf32>
    %198 = tpu.matmul %195, %13, %cst_61 {dimension_numbers = #tpu.dot_dimension_numbers<[1], [0], [0], [1], [0, 0, 1, 1], [], []>} : vector<8x128xf32>, vector<128x384xf32>, vector<8x384xf32> -> vector<8x384xf32>
    %199 = vector.broadcast %14 : vector<1x384xf32> to vector<8x384xf32>
    %200 = arith.addf %198, %199 : vector<8x384xf32>
    %201 = vector.extract_strided_slice %196 {offsets = [0, 0], sizes = [8, 128], strides = [1, 1]} : vector<8x384xf32> to vector<8x128xf32>
    %202 = vector.extract_strided_slice %196 {offsets = [0, 128], sizes = [8, 128], strides = [1, 1]} : vector<8x384xf32> to vector<8x128xf32>
    %203 = vector.extract_strided_slice %196 {offsets = [0, 256], sizes = [8, 128], strides = [1, 1]} : vector<8x384xf32> to vector<8x128xf32>
    %204 = vector.extract_strided_slice %200 {offsets = [0, 0], sizes = [8, 128], strides = [1, 1]} : vector<8x384xf32> to vector<8x128xf32>
    %205 = vector.extract_strided_slice %200 {offsets = [0, 128], sizes = [8, 128], strides = [1, 1]} : vector<8x384xf32> to vector<8x128xf32>
    %206 = vector.extract_strided_slice %200 {offsets = [0, 256], sizes = [8, 128], strides = [1, 1]} : vector<8x384xf32> to vector<8x128xf32>
    %207 = arith.addf %201, %204 : vector<8x128xf32>
    %208 = arith.negf %207 : vector<8x128xf32>
    %209 = math.exp %208 : vector<8x128xf32>
    %cst_62 = arith.constant 1.000000e+00 : f32
    %210 = vector.broadcast %cst_62 : f32 to vector<8x128xf32>
    %211 = arith.addf %210, %209 : vector<8x128xf32>
    %212 = arith.divf %210, %211 : vector<8x128xf32>
    %213 = arith.addf %202, %205 : vector<8x128xf32>
    %214 = arith.negf %213 : vector<8x128xf32>
    %215 = math.exp %214 : vector<8x128xf32>
    %cst_63 = arith.constant 1.000000e+00 : f32
    %216 = vector.broadcast %cst_63 : f32 to vector<8x128xf32>
    %217 = arith.addf %216, %215 : vector<8x128xf32>
    %218 = arith.divf %216, %217 : vector<8x128xf32>
    %219 = arith.mulf %212, %206 : vector<8x128xf32>
    %220 = arith.addf %203, %219 : vector<8x128xf32>
    %221 = math.tanh %220 : vector<8x128xf32>
    %222 = arith.mulf %197, %218 : vector<8x128xf32>
    %223 = arith.subf %195, %221 : vector<8x128xf32>
    %224 = arith.mulf %222, %223 : vector<8x128xf32>
    %225 = arith.subf %195, %224 : vector<8x128xf32>
    %c56 = arith.constant 56 : index
    %c0_64 = arith.constant 0 : index
    %226 = vector.load %arg9[%c56, %c0_64] : memref<64x384xf32, #tpu.memory_space<vmem>>, vector<8x384xf32>
    %c56_65 = arith.constant 56 : index
    %c0_66 = arith.constant 0 : index
    %227 = vector.load %arg10[%c56_65, %c0_66] : memref<64x128xf32, #tpu.memory_space<vmem>>, vector<8x128xf32>
    %cst_67 = arith.constant dense<0.000000e+00> : vector<8x384xf32>
    %228 = tpu.matmul %225, %13, %cst_67 {dimension_numbers = #tpu.dot_dimension_numbers<[1], [0], [0], [1], [0, 0, 1, 1], [], []>} : vector<8x128xf32>, vector<128x384xf32>, vector<8x384xf32> -> vector<8x384xf32>
    %229 = vector.broadcast %14 : vector<1x384xf32> to vector<8x384xf32>
    %230 = arith.addf %228, %229 : vector<8x384xf32>
    %231 = vector.extract_strided_slice %226 {offsets = [0, 0], sizes = [8, 128], strides = [1, 1]} : vector<8x384xf32> to vector<8x128xf32>
    %232 = vector.extract_strided_slice %226 {offsets = [0, 128], sizes = [8, 128], strides = [1, 1]} : vector<8x384xf32> to vector<8x128xf32>
    %233 = vector.extract_strided_slice %226 {offsets = [0, 256], sizes = [8, 128], strides = [1, 1]} : vector<8x384xf32> to vector<8x128xf32>
    %234 = vector.extract_strided_slice %230 {offsets = [0, 0], sizes = [8, 128], strides = [1, 1]} : vector<8x384xf32> to vector<8x128xf32>
    %235 = vector.extract_strided_slice %230 {offsets = [0, 128], sizes = [8, 128], strides = [1, 1]} : vector<8x384xf32> to vector<8x128xf32>
    %236 = vector.extract_strided_slice %230 {offsets = [0, 256], sizes = [8, 128], strides = [1, 1]} : vector<8x384xf32> to vector<8x128xf32>
    %237 = arith.addf %231, %234 : vector<8x128xf32>
    %238 = arith.negf %237 : vector<8x128xf32>
    %239 = math.exp %238 : vector<8x128xf32>
    %cst_68 = arith.constant 1.000000e+00 : f32
    %240 = vector.broadcast %cst_68 : f32 to vector<8x128xf32>
    %241 = arith.addf %240, %239 : vector<8x128xf32>
    %242 = arith.divf %240, %241 : vector<8x128xf32>
    %243 = arith.addf %232, %235 : vector<8x128xf32>
    %244 = arith.negf %243 : vector<8x128xf32>
    %245 = math.exp %244 : vector<8x128xf32>
    %cst_69 = arith.constant 1.000000e+00 : f32
    %246 = vector.broadcast %cst_69 : f32 to vector<8x128xf32>
    %247 = arith.addf %246, %245 : vector<8x128xf32>
    %248 = arith.divf %246, %247 : vector<8x128xf32>
    %249 = arith.mulf %242, %236 : vector<8x128xf32>
    %250 = arith.addf %233, %249 : vector<8x128xf32>
    %251 = math.tanh %250 : vector<8x128xf32>
    %252 = arith.mulf %227, %248 : vector<8x128xf32>
    %253 = arith.subf %225, %251 : vector<8x128xf32>
    %254 = arith.mulf %252, %253 : vector<8x128xf32>
    %255 = arith.subf %225, %254 : vector<8x128xf32>
    %c0_70 = arith.constant 0 : index
    %c0_71 = arith.constant 0 : index
    %256 = vector.load %arg8[%c0_70, %c0_71] : memref<8x128xf32, #tpu.memory_space<vmem>>, vector<8x128xf32>
    tpu.vector_store %arg8[%c0_70, %c0_71], %255 {strides = array<i32>} : memref<8x128xf32, #tpu.memory_space<vmem>>, vector<8x128xf32>,
    return
  }
  func.func @transform_0(%arg0: i32) -> (i32, i32, i32) {
    %c0_i32 = arith.constant 0 : i32
    %c0_i32_0 = arith.constant 0 : i32
    %c0_i32_1 = arith.constant 0 : i32
    return %c0_i32, %arg0, %c0_i32_0 : i32, i32, i32
  }
  func.func @transform_1(%arg0: i32) -> (i32, i32, i32) {
    %c0_i32 = arith.constant 0 : i32
    %c0_i32_0 = arith.constant 0 : i32
    %c0_i32_1 = arith.constant 0 : i32
    return %c0_i32, %arg0, %c0_i32_0 : i32, i32, i32
  }
  func.func @transform_2(%arg0: i32) -> (i32, i32) {
    %c0_i32 = arith.constant 0 : i32
    %c0_i32_0 = arith.constant 0 : i32
    %c0_i32_1 = arith.constant 0 : i32
    return %c0_i32, %c0_i32_0 : i32, i32
  }
  func.func @transform_3(%arg0: i32) -> (i32, i32) {
    %c0_i32 = arith.constant 0 : i32
    %c0_i32_0 = arith.constant 0 : i32
    %c0_i32_1 = arith.constant 0 : i32
    return %c0_i32, %c0_i32_0 : i32, i32
  }
  func.func @transform_4(%arg0: i32) -> (i32, i32) {
    %c0_i32 = arith.constant 0 : i32
    %c0_i32_0 = arith.constant 0 : i32
    %c0_i32_1 = arith.constant 0 : i32
    return %c0_i32, %c0_i32_0 : i32, i32
  }
  func.func @transform_5(%arg0: i32) -> (i32, i32) {
    %c0_i32 = arith.constant 0 : i32
    %c0_i32_0 = arith.constant 0 : i32
    %c0_i32_1 = arith.constant 0 : i32
    return %c0_i32, %c0_i32_0 : i32, i32
  }
  func.func @transform_6(%arg0: i32) -> (i32, i32) {
    %c0_i32 = arith.constant 0 : i32
    %c0_i32_0 = arith.constant 0 : i32
    %c0_i32_1 = arith.constant 0 : i32
    return %c0_i32, %c0_i32_0 : i32, i32
  }
  func.func @transform_7(%arg0: i32) -> (i32, i32) {
    %c0_i32 = arith.constant 0 : i32
    %c0_i32_0 = arith.constant 0 : i32
    return %arg0, %c0_i32 : i32, i32
  }
}

</mosaic_0001>

<bundles_post_ra>
// kernel: tpu_custom_call.1
= control target key start
LH: loop header
LB: loop body
LE: loop exit
PB: predicated region body
PF: predicated region fallthrough
CT: control target
= control target key end

     0   :  { %12 = vsyncpa [#allocation5], 0  ;;  %s3677_s0 = inlined_call_operand.vmem [shape: f32[8,8,32], index: 0, kind: input, shape index: {}]   ;;  %s3678_s1 = inlined_call_operand.vmem [shape: f32[8,8,3], index: 1, kind: input, shape index: {}]   ;;  %s3679_s2 = inlined_call_operand.hbm [shape: f32[32,384], index: 2, kind: input, shape index: {}]   ;;  %s3680_s3 = inlined_call_operand.hbm [shape: f32[128,384], index: 3, kind: input, shape index: {}]   ;;  %s3681_s4 = inlined_call_operand.vmem [shape: f32[1,384], index: 4, kind: input, shape index: {}]   ;;  %s3682_s5 = inlined_call_operand.vmem [shape: f32[1,384], index: 5, kind: input, shape index: {}]   ;;  %s3683_s6 = inlined_call_operand.vmem [shape: f32[3,128], index: 6, kind: input, shape index: {}]   ;;  %s3684_s7 = inlined_call_operand.hbm [shape: f32[8,128], index: 7, kind: output, shape index: {}]  }
   0x1   :  { %13 = vsyncpa [#allocation8], 0 }
   0x2   :  { %14 = vsyncpa [#allocation6], 0  ;;  %s2633_s24 = smov [#allocation4]  }
   0x3   :  { %s24_s25 = sshll.u32 %s2633_s24, 4  ;;  %s25_s25 = int_to_ptr.vmem [resolvable:$true] %s24_s25 }
   0x4   :  { %s2575_s26 = scalar_lea.vmem %s25_s25, 1536  ;;  %p2580_p1 = scmp.lt.s32.totalorder %s25_s25, %s25_s25 }
   0x5   :  { %p2576_p0 = scmp.ne.s32.totalorder %s25_s25, %s2575_s26  ;;  %p2581_p2 = scmp.lt.s32.totalorder %s2575_s26, %s2575_s26 }
   0x7   :  { %p2582_p3 = por %p2581_p2, %p2580_p1 }
   0x9   :  { %p2583_p4 = pnand %p2582_p3, %p2576_p0 }
   0xb   :  { %2586 = shalt.err (!%p2583_p4)
}
   0xc   :  { %s2634_s27 = smov 384   ;;  %s2635_s28 = smov 24  }
   0xd   :  { %30 = dma.hbm_to_vmem [thread:$0]  %s3679_s2, 1536, %s25_s25, [#allocation5], %s2634_s27, %s2634_s27, %s2635_s28  }
   0xe   :  { %s2636_s8 = smov [#allocation7]  }
   0xf   :  { %s36_s9 = sshll.u32 %s2636_s8, 4  ;;  %s37_s9 = int_to_ptr.vmem [resolvable:$true] %s36_s9 }
  0x10   :  { %s2595_s10 = scalar_lea.vmem %s37_s9, 6144  ;;  %p2600_p6 = scmp.lt.s32.totalorder %s37_s9, %s37_s9 }
  0x11   :  { %p2596_p5 = scmp.ne.s32.totalorder %s37_s9, %s2595_s10  ;;  %p2601_p7 = scmp.lt.s32.totalorder %s2595_s10, %s2595_s10 }
  0x13   :  { %p2602_p8 = por %p2601_p7, %p2600_p6 }
  0x15   :  { %p2603_p9 = pnand %p2602_p8, %p2596_p5 }
  0x17   :  { %2606 = shalt.err (!%p2603_p9)
}
  0x18   :  { %42 = dma.hbm_to_vmem [thread:$0]  %s3680_s3, 6144, %s37_s9, [#allocation8], %s2634_s27, %s2634_s27, %s2635_s28  }
  0x19   :  { %2627 = dma.done.wait [#allocation5], 1536  }
  0x1a   :  { %2628 = vsyncadd [#allocation5], 4294965760 }
  0x1b   :  { %2629 = dma.done.wait [#allocation8], 6144  }
  0x1c   :  { %2630 = vsyncadd [#allocation8], 4294961152  ;;  %v3685_v0 = vmov 0.0   ;;  %v73_v1 = vld [vmem:[#allocation4 + $0x50] sm:$0xff]  ;;  %v72_v2 = vld [vmem:[#allocation4 + $0x48] sm:$0xff]  ;;  %vm92_vm0 = vcmask 261120  }
  0x1d   :  { %181 = vmatprep.mubr.f32.mxu0 %v3685_v0  ;;  %v70_v3 = vld [vmem:[#allocation4 + $0x38] sm:$0xff]  ;;  %141 = vmatprep.subr.mxu0 %v73_v1  ;;  %v69_v4 = vld [vmem:[#allocation4 + $0x30] sm:$0xff]  ;;  %v67_v5 = vld [vmem:[#allocation4 + $0x20] sm:$0xff]  ;;  %vm393_vm1 = vcmask 1042432   ;;  %vm368_vm2 = vcmask 23552   ;;  %vm2638_vm3 = vmmov 0  }
  0x1e   :  { %142 = vmatpush1.msra.mxu0 %v72_v2  ;;  %v55_v6 = vld [vmem:[%s3677_s0] sm:$0xff]  ;;  %v66_v7 = vld [vmem:[#allocation4 + $0x18] sm:$0xff]  ;;  %v64_v8 = vld [vmem:[#allocation4 + $0x8] sm:$0xff] }
  0x1f   :  { %143 = vmatprep.subr.mxu0 %v70_v3  ;;  %2126 = vmatprep.mubr.msk.f32.mxu1 %vm92_vm0, %v55_v6  ;;  %v63_v9 = vld [vmem:[#allocation4] sm:$0xff]  ;;  %v2691_v10 = vld [vmem:[#allocation7 + $0x170] sm:$0xff]  ;;  %v2693_v11 = vld [vmem:[#allocation7 + $0x168] sm:$0xff] }
  0x20   :  { %144 = vmatpush1.msra.mxu0 %v69_v4  ;;  %3712 = vst [vmem:[#allocation13_spill] sm:$0xff] %v2691_v10  ;;  %v74_v12 = vld [vmem:[#allocation4 + $0x58] sm:$0xff]  ;;  %v2699_v14 = vld [vmem:[#allocation7 + $0x150] sm:$0xff]  ;;  %v71_v15 = vld [vmem:[#allocation4 + $0x40] sm:$0xff] }
  0x21   :  { %145 = vmatprep.subr.mxu0 %v67_v5  ;;  %v2695_v13 = vld [vmem:[#allocation7 + $0x158] sm:$0xff]  ;;  %2118 = vmatprep.subr.mxu1 %v74_v12  ;;  %v56_v16 = vld [vmem:[%s3677_s0 + $0x8] sm:$0xff]  ;;  %v2706_v17 = vld [vmem:[#allocation7 + $0x140] sm:$0xff] }
  0x22   :  { %146 = vmatpush1.msra.mxu0 %v66_v7  ;;  %v2709_v18 = vld [vmem:[#allocation7 + $0x138] sm:$0xff]  ;;  %2119 = vmatpush3.msra.mxu1 %v74_v12  ;;  %v2712_v19 = vld [vmem:[#allocation7 + $0x128] sm:$0xff]  ;;  %v2716_v20 = vld [vmem:[#allocation7 + $0x120] sm:$0xff] }
  0x23   :  { %147 = vmatprep.subr.mxu0 %v64_v8  ;;  %2120 = vmatprep.subr.mxu1 %v71_v15  ;;  %v68_v21 = vld [vmem:[#allocation4 + $0x28] sm:$0xff]  ;;  %v57_v22 = vld [vmem:[%s3677_s0 + $0x10] sm:$0xff]  ;;  %v2729_v25 = vld [vmem:[#allocation7 + $0xf8] sm:$0xff] }
  0x24   :  { %148 = vmatpush1.msra.mxu0 %v63_v9  ;;  %v2723_v23 = vld [vmem:[#allocation7 + $0x110] sm:$0xff]  ;;  %v2726_v24 = vld [vmem:[#allocation7 + $0x108] sm:$0xff]  ;;  %2121 = vmatpush3.msra.mxu1 %v71_v15  ;;  %v58_v28 = vld [vmem:[%s3677_s0 + $0x18] sm:$0xff] }
  0x25   :  { %1920 = vmatmul.mubr.msk.f32.vlgmr.msra.gmra.mxu0 %vm92_vm0, %v55_v6  ;;  %579 = vmatprep.subr.mxu0 %v2691_v10  ;;  %v2733_v26 = vld [vmem:[#allocation7 + $0xf0] sm:$0xff]  ;;  %v2740_v29 = vld [vmem:[#allocation7 + $0xe0] sm:$0xff]  ;;  %v2743_v30 = vld [vmem:[#allocation7 + $0xd8] sm:$0xff] }
  0x26   :  { %580 = vmatpush1.msra.mxu0 %v2693_v11  ;;  %187 = vmatprep.mubr.f32.mxu0 %v3685_v0  ;;  %v65_v27 = vld [vmem:[#allocation4 + $0x10] sm:$0xff]  ;;  %v2746_v31 = vld [vmem:[#allocation7 + $0xc8] sm:$0xff]  ;;  %v2750_v32 = vld [vmem:[#allocation7 + $0xc0] sm:$0xff] }
  0x27   :  { %581 = vmatprep.subr.mxu0 %v2695_v13  ;;  %2122 = vmatprep.subr.mxu1 %v68_v21  ;;  %v59_v33 = vld [vmem:[%s3677_s0 + $0x20] sm:$0xff]  ;;  %v2757_v34 = vld [vmem:[#allocation7 + $0xb0] sm:$0xff]  ;;  %v2760_v35 = vld [vmem:[#allocation7 + $0xa8] sm:$0xff] }
  0x28   :  { %582 = vmatpush1.msra.mxu0 %v2699_v14  ;;  %2123 = vmatpush3.msra.mxu1 %v68_v21  ;;  %v2764_v36 = vld [vmem:[#allocation7 + $0x98] sm:$0xff]  ;;  %v367_v37 = vld [vmem:[%s3683_s6] sm:$0x7]  ;;  %v2771_v38 = vld [vmem:[#allocation7 + $0x90] sm:$0xff] }
  0x29   :  { %1921 = vmatmul.mubr.msk.f32.gmra.mxu0 %vm92_vm0, %v56_v16  ;;  %583 = vmatprep.subr.mxu0 %v2706_v17  ;;  %v60_v39 = vld [vmem:[%s3677_s0 + $0x28] sm:$0xff]  ;;  %v2778_v40 = vld [vmem:[#allocation7 + $0x80] sm:$0xff]  ;;  %v2781_v41 = vld [vmem:[#allocation7 + $0x78] sm:$0xff] }
  0x2a   :  { %584 = vmatpush1.msra.mxu0 %v2709_v18  ;;  %193 = vmatprep.mubr.f32.mxu0 %v3685_v0  ;;  %v2784_v42 = vld [vmem:[#allocation7 + $0x68] sm:$0xff]  ;;  %v2788_v43 = vld [vmem:[#allocation7 + $0x60] sm:$0xff]  ;;  %v61_v44 = vld [vmem:[%s3677_s0 + $0x30] sm:$0xff] }
  0x2b   :  { %585 = vmatprep.subr.mxu0 %v2712_v19  ;;  %2124 = vmatprep.subr.mxu1 %v65_v27  ;;  %v2795_v45 = vld [vmem:[#allocation7 + $0x50] sm:$0xff]  ;;  %v2799_v46 = vld [vmem:[#allocation7 + $0x48] sm:$0xff]  ;;  %v2803_v47 = vld [vmem:[#allocation7 + $0x38] sm:$0xff] }
  0x2c   :  { %586 = vmatpush1.msra.mxu0 %v2716_v20  ;;  %2125 = vmatpush3.msra.mxu1 %v65_v27  ;;  %v2807_v48 = vld [vmem:[#allocation7 + $0x30] sm:$0xff]  ;;  %v62_v49 = vld [vmem:[%s3677_s0 + $0x38] sm:$0xff]  ;;  %v2814_v50 = vld [vmem:[#allocation7 + $0x20] sm:$0xff]  ;;  %v77_v27 = vlaneseq }
  0x2d   :  { %1922 = vmatmul.mubr.msk.f32.gmra.mxu0 %vm92_vm0, %v57_v22  ;;  %587 = vmatprep.subr.mxu0 %v2723_v23  ;;  %3713 = vst [vmem:[#allocation14_spill] sm:$0xff] %v2814_v50  ;;  %v2818_v51 = vld [vmem:[#allocation7 + $0x18] sm:$0xff]  ;;  %v2822_v52 = vld [vmem:[#allocation7 + $0x8] sm:$0xff]  ;;  %v2826_v53 = vld [vmem:[#allocation7] sm:$0xff] }
  0x2e   :  { %588 = vmatpush1.msra.mxu0 %v2726_v24  ;;  %199 = vmatprep.mubr.f32.mxu0 %v3685_v0  ;;  %3714 = vst [vmem:[#allocation15_spill] sm:$0xff] %v2818_v51  ;;  %3715 = vst [vmem:[#allocation16_spill] sm:$0xff] %v2822_v52  ;;  %v359_v54 = vld [vmem:[%s3678_s1] sm:$0xff]  ;;  %v360_v55 = vld [vmem:[%s3678_s1 + $0x8] sm:$0xff] }
  0x2f   :  { %589 = vmatprep.subr.mxu0 %v2729_v25  ;;  %2127 = vmatmul.mubr.msk.f32.vlgmr.msra.gmra.mxu1 %vm92_vm0, %v56_v16  ;;  %3716 = vst [vmem:[#allocation17_spill] sm:$0xff] %v2826_v53  ;;  %v2842_v56 = vld [vmem:[#allocation7 + $0x178] sm:$0xff]  ;;  %v361_v57 = vld [vmem:[%s3678_s1 + $0x10] sm:$0xff]  ;;  %v2850_v58 = vld [vmem:[#allocation7 + $0x160] sm:$0xff] }
  0x30   :  { %590 = vmatpush1.msra.mxu0 %v2733_v26  ;;  %2138 = vmatprep.subr.msk.mxu1 %vm393_vm1, %v367_v37  ;;  %v362_v59 = vld [vmem:[%s3678_s1 + $0x18] sm:$0xff]  ;;  %v2859_v60 = vld [vmem:[#allocation7 + $0x148] sm:$0xff]  ;;  %v363_v61 = vld [vmem:[%s3678_s1 + $0x20] sm:$0xff] }
  0x31   :  { %1923 = vmatmul.mubr.msk.f32.gmra.mxu0 %vm92_vm0, %v58_v28  ;;  %591 = vmatprep.subr.mxu0 %v2740_v29  ;;  %v2868_v62 = vld [vmem:[#allocation7 + $0x130] sm:$0xff]  ;;  %v364_v63 = vld [vmem:[%s3678_s1 + $0x28] sm:$0xff]  ;;  %v2877_v1 = vld [vmem:[#allocation7 + $0x118] sm:$0xff] }
  0x32   :  { %592 = vmatpush1.msra.mxu0 %v2743_v30  ;;  %205 = vmatprep.mubr.f32.mxu0 %v3685_v0  ;;  %v365_v2 = vld [vmem:[%s3678_s1 + $0x30] sm:$0xff]  ;;  %v2886_v3 = vld [vmem:[#allocation7 + $0x100] sm:$0xff]  ;;  %v366_v4 = vld [vmem:[%s3678_s1 + $0x38] sm:$0xff] }
  0x33   :  { %593 = vmatprep.subr.mxu0 %v2746_v31  ;;  %2139 = vmatpush3.msk.msra.mxu1 %vm393_vm1, %v367_v37  ;;  %v2895_v5 = vld [vmem:[#allocation7 + $0xe8] sm:$0xff]  ;;  %v2901_v6 = vld [vmem:[#allocation7 + $0xd0] sm:$0xff]  ;;  %v2908_v7 = vld [vmem:[#allocation7 + $0xb8] sm:$0xff] }
  0x34   :  { %594 = vmatpush1.msra.mxu0 %v2750_v32  ;;  %2129 = vmatprep.mubr.msk.f32.mxu1 %vm92_vm0, %v57_v22  ;;  %v2914_v8 = vld [vmem:[#allocation7 + $0xa0] sm:$0xff]  ;;  %v2920_v9 = vld [vmem:[#allocation7 + $0x88] sm:$0xff]  ;;  %v2926_v12 = vld [vmem:[#allocation7 + $0x70] sm:$0xff] }
  0x35   :  { %1924 = vmatmul.mubr.msk.f32.gmra.mxu0 %vm92_vm0, %v59_v33  ;;  %595 = vmatprep.subr.mxu0 %v2757_v34  ;;  %v2932_v15 = vld [vmem:[#allocation7 + $0x58] sm:$0xff]  ;;  %v2938_v16 = vld [vmem:[#allocation7 + $0x40] sm:$0xff]  ;;  %v2944_v21 = vld [vmem:[#allocation7 + $0x28] sm:$0xff] }
  0x36   :  { %596 = vmatpush1.msra.mxu0 %v2760_v35  ;;  %211 = vmatprep.mubr.f32.mxu0 %v3685_v0  ;;  %3717 = vst [vmem:[#allocation18_spill] sm:$0xff] %v2938_v16  ;;  %3718 = vst [vmem:[#allocation19_spill] sm:$0xff] %v2944_v21  ;;  %v2950_v22 = vld [vmem:[#allocation7 + $0x10] sm:$0xff]  ;;  %v75_v37 = vld [vmem:[%s3681_s4] sm:$0x7] }
  0x37   :  { %597 = vmatprep.subr.mxu0 %v2764_v36  ;;  %2130 = vmatmul.mubr.msk.f32.gmra.mxu1 %vm92_vm0, %v58_v28  ;;  %3719 = vst [vmem:[#allocation20_spill] sm:$0xff] %v2950_v22  ;;  %v3003_v28 = vshrl.u32 %v77_v27, 7 }
  0x38   :  { %598 = vmatpush1.msra.mxu0 %v2771_v38  ;;  %2132 = vmatprep.mubr.msk.f32.mxu1 %vm92_vm0, %v59_v33 }
  0x39   :  { %1925 = vmatmul.mubr.msk.f32.gmra.mxu0 %vm92_vm0, %v60_v39  ;;  %599 = vmatprep.subr.mxu0 %v2778_v40  ;;  %v79_v33 = vsub.s32 0, %v3003_v28 }
  0x3a   :  { %600 = vmatpush1.msra.mxu0 %v2781_v41  ;;  %217 = vmatprep.mubr.f32.mxu0 %v3685_v0 }
  0x3b   :  { %601 = vmatprep.subr.mxu0 %v2784_v42  ;;  %2133 = vmatmul.mubr.msk.f32.gmra.mxu1 %vm92_vm0, %v60_v39 }
  0x3c   :  { %602 = vmatpush1.msra.mxu0 %v2788_v43  ;;  %2135 = vmatprep.mubr.msk.f32.mxu1 %vm92_vm0, %v61_v44 }
  0x3d   :  { %1926 = vmatmul.mubr.msk.f32.gmra.mxu0 %vm92_vm0, %v61_v44  ;;  %603 = vmatprep.subr.mxu0 %v2795_v45  ;;  %v83_v44 = vsub.s32 1, %v3003_v28 }
  0x3e   :  { %604 = vmatpush1.msra.mxu0 %v2799_v46  ;;  %223 = vmatprep.mubr.f32.mxu0 %v3685_v0 }
  0x3f   :  { %605 = vmatprep.subr.mxu0 %v2803_v47  ;;  %2136 = vmatmul.mubr.msk.f32.gmra.mxu1 %vm92_vm0, %v62_v49 }
  0x40   :  { %606 = vmatpush1.msra.mxu0 %v2807_v48  ;;  %2140 = vmatprep.mubr.msk.f32.mxu1 %vm368_vm2, %v359_v54  ;;  %v80_v54 = vrot.slane %v75_v37, %v79_v33 }
  0x41   :  { %1927 = vmatmul.mubr.msk.f32.gmra.mxu0 %vm92_vm0, %v62_v49  ;;  %607 = vmatprep.subr.mxu0 %v2814_v50 }
  0x42   :  { %608 = vmatpush1.msra.mxu0 %v2818_v51  ;;  %643 = vmatprep.mubr.f32.mxu0 %v3685_v0 }
  0x43   :  { %609 = vmatprep.subr.mxu0 %v2822_v52  ;;  %2152 = vmatprep.subr.mxu1 %v3685_v0 }
  0x44   :  { %610 = vmatpush1.msra.mxu0 %v2826_v53  ;;  %2141 = vmatmul.mubr.msk.f32.vlgmr.msra.gmra.mxu1 %vm368_vm2, %v360_v55 }
  0x45   :  { %644 = vmatmul.mubr.f32.vlgmr.msra.gmra.mxu0 %v3685_v0  ;;  %745 = vmatprep.subr.mxu0 %v2691_v10 }
  0x46   :  { %746 = vmatpush1.msra.mxu0 %v2693_v11  ;;  %2153 = vmatpush3.msra.mxu1 %v2842_v56 }
  0x47   :  { %2143 = vmatprep.mubr.msk.f32.mxu1 %vm368_vm2, %v361_v57  ;;  %2154 = vmatprep.subr.mxu1 %v3685_v0  ;;  %v84_v57 = vrot.slane %v75_v37, %v83_v44 }
  0x48   :  { %747 = vmatprep.subr.mxu0 %v2695_v13  ;;  %2155 = vmatpush3.msra.mxu1 %v2850_v58 }
  0x49   :  { %748 = vmatpush1.msra.mxu0 %v2699_v14  ;;  %2156 = vmatprep.subr.mxu1 %v3685_v0 }
  0x4a   :  { %2144 = vmatmul.mubr.msk.f32.gmra.mxu1 %vm368_vm2, %v362_v59  ;;  %749 = vmatprep.subr.mxu0 %v2706_v17 }
  0x4b   :  { %2157 = vmatpush3.msra.mxu1 %v2859_v60  ;;  %2146 = vmatprep.mubr.msk.f32.mxu1 %vm368_vm2, %v363_v61 }
  0x4c   :  { %2158 = vmatprep.subr.mxu1 %v3685_v0  ;;  %750 = vmatpush1.msra.mxu0 %v2709_v18 }
  0x4d   :  { %2159 = vmatpush3.msra.mxu1 %v2868_v62  ;;  %751 = vmatprep.subr.mxu0 %v2712_v19 }
  0x4e   :  { %2160 = vmatprep.subr.mxu1 %v3685_v0  ;;  %2147 = vmatmul.mubr.msk.f32.gmra.mxu1 %vm368_vm2, %v364_v63 }
  0x4f   :  { %2161 = vmatpush3.msra.mxu1 %v2877_v1  ;;  %2149 = vmatprep.mubr.msk.f32.mxu1 %vm368_vm2, %v365_v2 }
  0x50   :  { %2162 = vmatprep.subr.mxu1 %v3685_v0  ;;  %752 = vmatpush1.msra.mxu0 %v2716_v20 }
  0x51   :  { %2163 = vmatpush3.msra.mxu1 %v2886_v3  ;;  %753 = vmatprep.subr.mxu0 %v2723_v23 }
  0x52   :  { %2164 = vmatprep.subr.mxu1 %v3685_v0  ;;  %2150 = vmatmul.mubr.msk.f32.gmra.mxu1 %vm368_vm2, %v366_v4  ;;  %v3701_v4 = vsub.s32 2, %v3003_v28 }
  0x53   :  { %2165 = vmatpush3.msra.mxu1 %v2895_v5  ;;  %2184 = vmatprep.mubr.msk.f32.mxu1 %vm2638_vm3, %v3685_v0 }
  0x54   :  { %2166 = vmatprep.subr.mxu1 %v3685_v0  ;;  %754 = vmatpush1.msra.mxu0 %v2726_v24 }
  0x55   :  { %2167 = vmatpush3.msra.mxu1 %v2901_v6  ;;  %755 = vmatprep.subr.mxu0 %v2729_v25 }
  0x56   :  { %2168 = vmatprep.subr.mxu1 %v3685_v0  ;;  %756 = vmatpush1.msra.mxu0 %v2733_v26 }
  0x57   :  { %2169 = vmatpush3.msra.mxu1 %v2908_v7  ;;  %757 = vmatprep.subr.mxu0 %v2740_v29 }
  0x58   :  { %2170 = vmatprep.subr.mxu1 %v3685_v0  ;;  %758 = vmatpush1.msra.mxu0 %v2743_v30 }
  0x59   :  { %2171 = vmatpush3.msra.mxu1 %v2914_v8  ;;  %759 = vmatprep.subr.mxu0 %v2746_v31 }
  0x5a   :  { %2172 = vmatprep.subr.mxu1 %v3685_v0  ;;  %760 = vmatpush1.msra.mxu0 %v2750_v32 }
  0x5b   :  { %2173 = vmatpush3.msra.mxu1 %v2920_v9  ;;  %761 = vmatprep.subr.mxu0 %v2757_v34 }
  0x5c   :  { %2174 = vmatprep.subr.mxu1 %v3685_v0  ;;  %762 = vmatpush1.msra.mxu0 %v2760_v35 }
  0x5d   :  { %2175 = vmatpush3.msra.mxu1 %v2926_v12  ;;  %763 = vmatprep.subr.mxu0 %v2764_v36 }
  0x5e   :  { %2176 = vmatprep.subr.mxu1 %v3685_v0  ;;  %764 = vmatpush1.msra.mxu0 %v2771_v38 }
  0x5f   :  { %2177 = vmatpush3.msra.mxu1 %v2932_v15  ;;  %765 = vmatprep.subr.mxu0 %v2778_v40 }
  0x60   :  { %2178 = vmatprep.subr.mxu1 %v3685_v0  ;;  %766 = vmatpush1.msra.mxu0 %v2781_v41 }
  0x61   :  { %2179 = vmatpush3.msra.mxu1 %v2938_v16  ;;  %767 = vmatprep.subr.mxu0 %v2784_v42 }
  0x62   :  { %2180 = vmatprep.subr.mxu1 %v3685_v0  ;;  %768 = vmatpush1.msra.mxu0 %v2788_v43 }
  0x63   :  { %2181 = vmatpush3.msra.mxu1 %v2944_v21  ;;  %769 = vmatprep.subr.mxu0 %v2795_v45 }
  0x64   :  { %2182 = vmatprep.subr.mxu1 %v3685_v0  ;;  %770 = vmatpush1.msra.mxu0 %v2799_v46 }
  0x65   :  { %2183 = vmatpush3.msra.mxu1 %v2950_v22  ;;  %771 = vmatprep.subr.mxu0 %v2803_v47 }
  0x66   :  { %2185 = vmatmul.mubr.f32.vlgmr.msra.gmra.mxu1 %v3685_v0  ;;  %2187 = vmatprep.subr.mxu1 %v3685_v0 }
  0x67   :  { %2188 = vmatpush3.msra.mxu1 %v2842_v56  ;;  %772 = vmatpush1.msra.mxu0 %v2807_v48 }
  0x68   :  { %2189 = vmatprep.subr.mxu1 %v3685_v0  ;;  %773 = vmatprep.subr.mxu0 %v2814_v50 }
  0x69   :  { %2190 = vmatpush3.msra.mxu1 %v2850_v58  ;;  %774 = vmatpush1.msra.mxu0 %v2818_v51 }
  0x6a   :  { %2191 = vmatprep.subr.mxu1 %v3685_v0  ;;  %775 = vmatprep.subr.mxu0 %v2822_v52 }
  0x6b   :  { %2192 = vmatpush3.msra.mxu1 %v2859_v60  ;;  %776 = vmatpush1.msra.mxu0 %v2826_v53  ;;  %v3021_v53 = vrot.slane %v75_v37, %v3701_v4 }
  0x6c   :  { %2193 = vmatprep.subr.mxu1 %v3685_v0  ;;  %809 = vmatprep.mubr.f32.mxu0 %v3685_v0 }
  0x6d   :  { %2194 = vmatpush3.msra.mxu1 %v2868_v62  ;;  %2219 = vmatprep.mubr.msk.f32.mxu1 %vm2638_vm3, %v3685_v0 }
  0x6e   :  { %2195 = vmatprep.subr.mxu1 %v3685_v0  ;;  %911 = vmatprep.subr.mxu0 %v2691_v10 }
  0x6f   :  { %2196 = vmatpush3.msra.mxu1 %v2877_v1 }
  0x70   :  { %2197 = vmatprep.subr.mxu1 %v3685_v0 }
  0x71   :  { %2198 = vmatpush3.msra.mxu1 %v2886_v3 }
  0x72   :  { %2199 = vmatprep.subr.mxu1 %v3685_v0 }
  0x73   :  { %2200 = vmatpush3.msra.mxu1 %v2895_v5 }
  0x74   :  { %2201 = vmatprep.subr.mxu1 %v3685_v0 }
  0x75   :  { %2202 = vmatpush3.msra.mxu1 %v2901_v6 }
  0x76   :  { %2203 = vmatprep.subr.mxu1 %v3685_v0 }
  0x77   :  { %2204 = vmatpush3.msra.mxu1 %v2908_v7 }
  0x78   :  { %2205 = vmatprep.subr.mxu1 %v3685_v0 }
  0x79   :  { %2206 = vmatpush3.msra.mxu1 %v2914_v8 }
  0x7a   :  { %2207 = vmatprep.subr.mxu1 %v3685_v0 }
  0x7b   :  { %2208 = vmatpush3.msra.mxu1 %v2920_v9 }
  0x7c   :  { %2209 = vmatprep.subr.mxu1 %v3685_v0 }
  0x7d   :  { %2210 = vmatpush3.msra.mxu1 %v2926_v12 }
  0x7e   :  { %2211 = vmatprep.subr.mxu1 %v3685_v0 }
  0x7f   :  { %2212 = vmatpush3.msra.mxu1 %v2932_v15 }
  0x80   :  { %2213 = vmatprep.subr.mxu1 %v3685_v0 }
  0x81   :  { %2214 = vmatpush3.msra.mxu1 %v2938_v16 }
  0x82   :  { %2215 = vmatprep.subr.mxu1 %v3685_v0 }
  0x83   :  { %2216 = vmatpush3.msra.mxu1 %v2944_v21 }
  0x84   :  { %2217 = vmatprep.subr.mxu1 %v3685_v0 }
  0x85   :  { %2218 = vmatpush3.msra.mxu1 %v2950_v22 }
  0x86   :  { %2222 = vmatprep.subr.mxu1 %v3685_v0 }
  0xe5   :  { %v183_v39 = vpop.f32.mrf.mxu0 }
  0xe7   :  { %v185_v49 = vpop.f32.mrf.mxu0 }
  0xe9   :  { %v189_v55 = vpop.f32.mrf.mxu0 }
  0xea   :  { %v3010_v59 = vadd.f32 %v189_v55, %v80_v54 }
  0xeb   :  { %v191_v61 = vpop.f32.mrf.mxu0 }
  0xec   :  { %3720 = vst [vmem:[#allocation21_spill] sm:$0xff] %v3010_v59  ;;  %v3012_v63 = vadd.f32 %v191_v61, %v84_v57 }
  0xed   :  { %v195_v2 = vpop.f32.mrf.mxu0 }
  0xee   :  { %3721 = vst [vmem:[#allocation22_spill] sm:$0xff] %v3012_v63  ;;  %v3015_v27 = vadd.f32 %v195_v2, %v80_v54 }
  0xef   :  { %v197_v0 = vpop.f32.mrf.mxu0  ;;  %v2128_v61 = vpop.f32.mrf.mxu1 }
  0xf0   :  { %3722 = vst [vmem:[#allocation23_spill] sm:$0xff] %v3015_v27  ;;  %v3017_v10 = vadd.f32 %v197_v0, %v84_v57  ;;  %v3028_v21 = vadd.f32 %v2128_v61, %v3021_v53 }
  0xf1   :  { %v201_v22 = vpop.f32.mrf.mxu0  ;;  %v296_v0 = vpop.f32.mrf.mxu1 }
  0xf2   :  { %3723 = vst [vmem:[#allocation24_spill] sm:$0xff] %v3017_v10  ;;  %v3023_v52 = vadd.f32 %v201_v22, %v80_v54  ;;  %3726 = vst [vmem:[#allocation27_spill] sm:$0xff] %v3028_v21 }
  0xf3   :  { %v203_v55 = vpop.f32.mrf.mxu0 }
  0xf4   :  { %3724 = vst [vmem:[#allocation25_spill] sm:$0xff] %v3023_v52  ;;  %v3025_v59 = vadd.f32 %v203_v55, %v84_v57 }
  0xf5   :  { %v207_v63 = vpop.f32.mrf.mxu0 }
  0xf6   :  { %3725 = vst [vmem:[#allocation26_spill] sm:$0xff] %v3025_v59  ;;  %v3030_v2 = vadd.f32 %v207_v63, %v80_v54 }
  0xf7   :  { %v209_v27 = vpop.f32.mrf.mxu0  ;;  %v2131_v22 = vpop.f32.mrf.mxu1 }
  0xf8   :  { %3727 = vst [vmem:[#allocation28_spill] sm:$0xff] %v3030_v2  ;;  %v3032_v10 = vadd.f32 %v209_v27, %v84_v57  ;;  %v3039_v55 = vadd.f32 %v2131_v22, %v3021_v53 }
  0xf9   :  { %v213_v51 = vpop.f32.mrf.mxu0  ;;  %v306_v52 = vpop.f32.mrf.mxu1 }
  0xfa   :  { %3728 = vst [vmem:[#allocation29_spill] sm:$0xff] %v3032_v10  ;;  %v3034_v50 = vadd.f32 %v213_v51, %v80_v54  ;;  %3731 = vst [vmem:[#allocation32_spill] sm:$0xff] %v3039_v55  ;;  %v3044_v63 = vadd.f32 %v306_v52, %v3021_v53  ;;  %v558_v51 = vld [vmem:[%s3682_s5] sm:$0x7]  ;;  %s2639_s5 = smov [#allocation9]  }
  0xfb   :  { %v215_v37 = vpop.f32.mrf.mxu0  ;;  %v2134_v27 = vpop.f32.mrf.mxu1  ;;  %v3059_v52 = vrot.slane %v558_v51, %v79_v33  ;;  %s1910_s20 = sshll.u32 %s2639_s5, 4  ;;  %s1911_s20 = int_to_ptr.vmem [resolvable:$true] %s1910_s20 }
  0xfc   :  { %3729 = vst [vmem:[#allocation30_spill] sm:$0xff] %v3034_v50  ;;  %v3036_v4 = vadd.f32 %v215_v37, %v84_v57  ;;  %3733 = vst [vmem:[#allocation34_spill] sm:$0xff] %v3044_v63  ;;  %v3052_v37 = vadd.f32 %v2134_v27, %v3021_v53  ;;  %v184_v27 = vadd.f32 %v183_v39, %v80_v54  ;;  %s2607_s21 = scalar_lea.vmem %s1911_s20, 128  ;;  %p2612_p11 = scmp.lt.s32.totalorder %s1911_s20, %s1911_s20 }
  0xfd   :  { %v219_v59 = vpop.f32.mrf.mxu0  ;;  %3738 = vst [vmem:[#allocation39_spill] sm:$0xff] %v3059_v52  ;;  %p2608_p10 = scmp.ne.s32.totalorder %s1911_s20, %s2607_s21  ;;  %p2613_p12 = scmp.lt.s32.totalorder %s2607_s21, %s2607_s21 }
  0xfe   :  { %3730 = vst [vmem:[#allocation31_spill] sm:$0xff] %v3036_v4  ;;  %v3041_v61 = vadd.f32 %v219_v59, %v80_v54  ;;  %3735 = vst [vmem:[#allocation36_spill] sm:$0xff] %v3052_v37  ;;  %v316_v4 = vpop.f32.mrf.mxu1 }
  0xff   :  { %v221_v2 = vpop.f32.mrf.mxu0  ;;  %v3057_v59 = vadd.f32 %v316_v4, %v3021_v53  ;;  %v3070_v4 = vrot.slane %v558_v51, %v83_v44  ;;  %p2614_p13 = por %p2613_p12, %p2612_p11 }
 0x100   :  { %3732 = vst [vmem:[#allocation33_spill] sm:$0xff] %v3041_v61  ;;  %v3049_v50 = vadd.f32 %v221_v2, %v84_v57  ;;  %v2137_v55 = vpop.f32.mrf.mxu1 }
 0x101   :  { %v225_v22 = vpop.f32.mrf.mxu0  ;;  %3737 = vst [vmem:[#allocation38_spill] sm:$0xff] %v3057_v59  ;;  %v3064_v21 = vadd.f32 %v2137_v55, %v3021_v53  ;;  %p2615_p0 = pnand %p2614_p13, %p2608_p10 }
 0x102   :  { %3734 = vst [vmem:[#allocation35_spill] sm:$0xff] %v3049_v50  ;;  %v3054_v10 = vadd.f32 %v225_v22, %v80_v54  ;;  %v326_v2 = vpop.f32.mrf.mxu1 }
 0x103   :  { %v227_v61 = vpop.f32.mrf.mxu0  ;;  %3740 = vst [vmem:[#allocation41_spill] sm:$0xff] %v3064_v21  ;;  %v3067_v37 = vadd.f32 %v326_v2, %v3021_v53  ;;  %v186_v21 = vadd.f32 %v185_v49, %v84_v57  ;;  %v3748_v49 = vsub.s32 2, %v3003_v28 }
 0x104   :  { %3736 = vst [vmem:[#allocation37_spill] sm:$0xff] %v3054_v10  ;;  %v3061_v63 = vadd.f32 %v227_v61, %v84_v57  ;;  %v3072_v33 = vpop.f32.mrf.mxu1 }
 0x105   :  { %v645_v50 = vpop.f32.mrf.mxu0  ;;  %3741 = vst [vmem:[#allocation42_spill] sm:$0xff] %v3067_v37  ;;  %v3089_v57 = vrot.slane %v558_v51, %v3748_v49  ;;  %v3757_v49 = vld [vmem:[#allocation13_spill] sm:$0xff] }
 0x106   :  { %3739 = vst [vmem:[#allocation40_spill] sm:$0xff] %v3061_v63  ;;  %v646_v22 = vadd.f32 %v645_v50, %v3059_v52  ;;  %v463_v55 = vpop.f32.mrf.mxu1 }
 0x107   :  { %v647_v59 = vpop.f32.mrf.mxu0 }
 0x108   :  { %v720_v10 = vadd.f32 %v646_v22, %v184_v27  ;;  %v648_v61 = vadd.f32 %v647_v59, %v3070_v4 }
 0x10a   :  { %v1945_v16 = vmul.f32 -1.442695, %v720_v10  ;;  %v3075_v63 = vpop.f32.mrf.mxu1  ;;  %v727_v39 = vadd.f32 %v648_v61, %v186_v21 }
 0x10b   :  { %3742 = vst [vmem:[#allocation43_spill] sm:$0xff] %v3075_v63 }
 0x10c   :  { %2439 = vpow2.f32 %v1945_v16  ;;  %v3077_v54 = vpop.f32.mrf.mxu1  ;;  %v1946_v2 = vmul.f32 -1.442695, %v727_v39 }
 0x10d   :  { %3743 = vst [vmem:[#allocation44_spill] sm:$0xff] %v3077_v54  ;;  %v3759_v54 = vld [vmem:[#allocation22_spill] sm:$0xff] }
 0x10e   :  { %v3079_v37 = vpop.f32.mrf.mxu1  ;;  %2441 = vpow2.f32 %v1946_v2 }
 0x10f   :  { %3744 = vst [vmem:[#allocation45_spill] sm:$0xff] %v3079_v37 }
 0x110   :  { %v3081_v27 = vpop.f32.mrf.mxu1 }
 0x111   :  { %3745 = vst [vmem:[#allocation46_spill] sm:$0xff] %v3081_v27 }
 0x112   :  { %v3083_v10 = vpop.f32.mrf.mxu1 }
 0x113   :  { %3746 = vst [vmem:[#allocation47_spill] sm:$0xff] %v3083_v10 }
 0x114   :  { %v3085_v16 = vpop.f32.mrf.mxu1 }
 0x115   :  { %3747 = vst [vmem:[#allocation48_spill] sm:$0xff] %v3085_v16 }
 0x119   :  { %v2440_v50 = vpop.eup %2439 }
 0x11a   :  { %v724_v44 = vadd.f32 1.0, %v2440_v50  ;;  %v297_v50 = vadd.f32 %v296_v0, %v3021_v53  ;;  %v3749_v53 = vmov 0.0   ;;  %v3750_v0 = vld [vmem:[#allocation18_spill] sm:$0xff] }
 0x11b   :  { %v2442_v21 = vpop.eup %2441 }
 0x11c   :  { %2443 = vrcp.f32 %v724_v44  ;;  %v731_v22 = vadd.f32 1.0, %v2442_v21 }
 0x11e   :  { %2445 = vrcp.f32 %v731_v22 }
 0x126   :  { %v716_v59 = vpop.f32.mrf.mxu1 }
 0x127   :  { %v717_v61 = vadd.f32 %v716_v59, %v3089_v57 }
 0x128   :  { %v2186_v2 = vpop.f32.mrf.mxu1 }
 0x129   :  { %v2444_v39 = vpop.eup %2443 }
 0x12a   :  { %v734_v37 = vmul.f32 %v2444_v39, %v717_v61  ;;  %v3758_v39 = vld [vmem:[#allocation21_spill] sm:$0xff] }
 0x12b   :  { %v2446_v10 = vpop.eup %2445 }
 0x12c   :  { %v735_v44 = vadd.f32 %v734_v37, %v297_v50  ;;  %v737_v16 = vmul.f32 %v2446_v10, %v463_v55  ;;  %v3752_v37 = vld [vmem:[#allocation15_spill] sm:$0xff]  ;;  %v3755_v10 = vld [vmem:[#allocation17_spill] sm:$0xff] }
 0x12d   :  { %v3753_v55 = vld [vmem:[#allocation19_spill] sm:$0xff] }
 0x12e   :  { %2447 = vtanh.f32 %v735_v44 }
 0x13b   :  { %v2448_v27 = vpop.eup %2447 }
 0x13c   :  { %v738_v63 = vsub.f32 0.0, %v2448_v27  ;;  %v3754_v27 = vld [vmem:[#allocation16_spill] sm:$0xff] }
 0x13e   :  { %v739_v28 = vmul.f32 %v738_v63, %v737_v16  ;;  %v3751_v63 = vld [vmem:[#allocation14_spill] sm:$0xff]  ;;  %v3756_v16 = vld [vmem:[#allocation20_spill] sm:$0xff] }
 0x140   :  { %v3093_v51 = vsub.f32 0.0, %v739_v28 }
 0x142   :  { %810 = vmatmul.mubr.f32.vlgmr.msra.gmra.mxu0 %v3093_v51  ;;  %2220 = vmatmul.mubr.f32.vlgmr.msra.gmra.mxu1 %v3093_v51 }
 0x143   :  { %912 = vmatpush1.msra.mxu0 %v2693_v11  ;;  %2223 = vmatpush3.msra.mxu1 %v2842_v56 }
 0x144   :  { %913 = vmatprep.subr.mxu0 %v2695_v13  ;;  %2224 = vmatprep.subr.mxu1 %v3749_v53 }
 0x145   :  { %914 = vmatpush1.msra.mxu0 %v2699_v14  ;;  %2225 = vmatpush3.msra.mxu1 %v2850_v58 }
 0x146   :  { %915 = vmatprep.subr.mxu0 %v2706_v17  ;;  %2226 = vmatprep.subr.mxu1 %v3749_v53 }
 0x147   :  { %916 = vmatpush1.msra.mxu0 %v2709_v18  ;;  %2227 = vmatpush3.msra.mxu1 %v2859_v60 }
 0x148   :  { %917 = vmatprep.subr.mxu0 %v2712_v19  ;;  %2228 = vmatprep.subr.mxu1 %v3749_v53 }
 0x149   :  { %918 = vmatpush1.msra.mxu0 %v2716_v20  ;;  %2229 = vmatpush3.msra.mxu1 %v2868_v62 }
 0x14a   :  { %919 = vmatprep.subr.mxu0 %v2723_v23  ;;  %2230 = vmatprep.subr.mxu1 %v3749_v53 }
 0x14b   :  { %920 = vmatpush1.msra.mxu0 %v2726_v24  ;;  %2231 = vmatpush3.msra.mxu1 %v2877_v1 }
 0x14c   :  { %921 = vmatprep.subr.mxu0 %v2729_v25  ;;  %2232 = vmatprep.subr.mxu1 %v3749_v53 }
 0x14d   :  { %922 = vmatpush1.msra.mxu0 %v2733_v26  ;;  %2233 = vmatpush3.msra.mxu1 %v2886_v3 }
 0x14e   :  { %923 = vmatprep.subr.mxu0 %v2740_v29  ;;  %2234 = vmatprep.subr.mxu1 %v3749_v53 }
 0x14f   :  { %924 = vmatpush1.msra.mxu0 %v2743_v30  ;;  %2235 = vmatpush3.msra.mxu1 %v2895_v5 }
 0x150   :  { %925 = vmatprep.subr.mxu0 %v2746_v31  ;;  %2236 = vmatprep.subr.mxu1 %v3749_v53 }
 0x151   :  { %926 = vmatpush1.msra.mxu0 %v2750_v32  ;;  %2237 = vmatpush3.msra.mxu1 %v2901_v6 }
 0x152   :  { %927 = vmatprep.subr.mxu0 %v2757_v34  ;;  %2238 = vmatprep.subr.mxu1 %v3749_v53 }
 0x153   :  { %928 = vmatpush1.msra.mxu0 %v2760_v35  ;;  %2239 = vmatpush3.msra.mxu1 %v2908_v7 }
 0x154   :  { %929 = vmatprep.subr.mxu0 %v2764_v36  ;;  %2240 = vmatprep.subr.mxu1 %v3749_v53 }
 0x155   :  { %930 = vmatpush1.msra.mxu0 %v2771_v38  ;;  %2241 = vmatpush3.msra.mxu1 %v2914_v8 }
 0x156   :  { %931 = vmatprep.subr.mxu0 %v2778_v40  ;;  %2242 = vmatprep.subr.mxu1 %v3749_v53 }
 0x157   :  { %932 = vmatpush1.msra.mxu0 %v2781_v41  ;;  %2243 = vmatpush3.msra.mxu1 %v2920_v9 }
 0x158   :  { %933 = vmatprep.subr.mxu0 %v2784_v42  ;;  %2244 = vmatprep.subr.mxu1 %v3749_v53 }
 0x159   :  { %934 = vmatpush1.msra.mxu0 %v2788_v43  ;;  %2245 = vmatpush3.msra.mxu1 %v2926_v12 }
 0x15a   :  { %935 = vmatprep.subr.mxu0 %v2795_v45  ;;  %2246 = vmatprep.subr.mxu1 %v3749_v53 }
 0x15b   :  { %936 = vmatpush1.msra.mxu0 %v2799_v46  ;;  %2247 = vmatpush3.msra.mxu1 %v2932_v15 }
 0x15c   :  { %937 = vmatprep.subr.mxu0 %v2803_v47  ;;  %2248 = vmatprep.subr.mxu1 %v3749_v53 }
 0x15d   :  { %938 = vmatpush1.msra.mxu0 %v2807_v48  ;;  %2249 = vmatpush3.msra.mxu1 %v3750_v0 }
 0x15e   :  { %939 = vmatprep.subr.mxu0 %v3751_v63  ;;  %2250 = vmatprep.subr.mxu1 %v3749_v53 }
 0x15f   :  { %940 = vmatpush1.msra.mxu0 %v3752_v37  ;;  %2251 = vmatpush3.msra.mxu1 %v3753_v55 }
 0x160   :  { %941 = vmatprep.subr.mxu0 %v3754_v27  ;;  %2252 = vmatprep.subr.mxu1 %v3749_v53 }
 0x161   :  { %942 = vmatpush1.msra.mxu0 %v3755_v10  ;;  %975 = vmatprep.mubr.f32.mxu0 %v3749_v53 }
 0x162   :  { %2253 = vmatpush3.msra.mxu1 %v3756_v16  ;;  %2254 = vmatprep.mubr.msk.f32.mxu1 %vm2638_vm3, %v3749_v53 }
 0x163   :  { %1077 = vmatprep.subr.mxu0 %v3757_v49  ;;  %2257 = vmatprep.subr.mxu1 %v3749_v53 }
 0x202   :  { %v811_v21 = vpop.f32.mrf.mxu0  ;;  %v882_v59 = vpop.f32.mrf.mxu1 }
 0x203   :  { %v812_v22 = vadd.f32 %v811_v21, %v3059_v52  ;;  %v883_v37 = vadd.f32 %v882_v59, %v3089_v57  ;;  %v3760_v52 = vld [vmem:[#allocation27_spill] sm:$0xff]  ;;  %v3771_v59 = vld [vmem:[#allocation34_spill] sm:$0xff] }
 0x204   :  { %v2221_v61 = vpop.f32.mrf.mxu1  ;;  %v813_v50 = vpop.f32.mrf.mxu0 }
 0x205   :  { %v886_v2 = vadd.f32 %v812_v22, %v3758_v39  ;;  %v814_v28 = vadd.f32 %v813_v50, %v3070_v4 }
 0x207   :  { %v1947_v44 = vmul.f32 -1.442695, %v886_v2  ;;  %v893_v16 = vadd.f32 %v814_v28, %v3759_v54 }
 0x209   :  { %2449 = vpow2.f32 %v1947_v44  ;;  %v1948_v10 = vmul.f32 -1.442695, %v893_v16 }
 0x20b   :  { %2451 = vpow2.f32 %v1948_v10 }
 0x216   :  { %v2450_v27 = vpop.eup %2449 }
 0x217   :  { %v890_v49 = vadd.f32 1.0, %v2450_v27 }
 0x218   :  { %v2452_v55 = vpop.eup %2451 }
 0x219   :  { %2453 = vrcp.f32 %v890_v49  ;;  %v897_v63 = vadd.f32 1.0, %v2452_v55 }
 0x21b   :  { %2455 = vrcp.f32 %v897_v63 }
 0x226   :  { %v2454_v21 = vpop.eup %2453 }
 0x227   :  { %v900_v61 = vmul.f32 %v2454_v21, %v883_v37 }
 0x228   :  { %v2456_v39 = vpop.eup %2455 }
 0x229   :  { %v901_v22 = vadd.f32 %v900_v61, %v3760_v52  ;;  %v903_v50 = vmul.f32 %v2456_v39, %v3072_v33  ;;  %v3772_v61 = vld [vmem:[#allocation44_spill] sm:$0xff] }
 0x22b   :  { %2457 = vtanh.f32 %v901_v22 }
 0x238   :  { %v2458_v2 = vpop.eup %2457 }
 0x239   :  { %v904_v54 = vsub.f32 %v3093_v51, %v2458_v2 }
 0x23b   :  { %v905_v10 = vmul.f32 %v904_v54, %v903_v50  ;;  %v3257_v54 = vld [vmem:[#allocation7 + $0x168] sm:$0xff] }
 0x23d   :  { %v3173_v27 = vsub.f32 %v3093_v51, %v905_v10  ;;  %v3261_v10 = vld [vmem:[#allocation7 + $0x158] sm:$0xff] }
 0x23f   :  { %976 = vmatmul.mubr.f32.vlgmr.msra.gmra.mxu0 %v3173_v27  ;;  %2255 = vmatmul.mubr.f32.vlgmr.msra.gmra.mxu1 %v3173_v27 }
 0x240   :  { %1078 = vmatpush1.msra.mxu0 %v2693_v11  ;;  %2258 = vmatpush3.msra.mxu1 %v2842_v56  ;;  %v3761_v11 = vld [vmem:[#allocation14_spill] sm:$0xff] }
 0x241   :  { %1079 = vmatprep.subr.mxu0 %v2695_v13  ;;  %2259 = vmatprep.subr.mxu1 %v3749_v53  ;;  %v3762_v13 = vld [vmem:[#allocation15_spill] sm:$0xff] }
 0x242   :  { %1080 = vmatpush1.msra.mxu0 %v2699_v14  ;;  %2260 = vmatpush3.msra.mxu1 %v2850_v58  ;;  %v3763_v14 = vld [vmem:[#allocation19_spill] sm:$0xff] }
 0x243   :  { %1081 = vmatprep.subr.mxu0 %v2706_v17  ;;  %2261 = vmatprep.subr.mxu1 %v3749_v53  ;;  %v3764_v17 = vld [vmem:[#allocation16_spill] sm:$0xff] }
 0x244   :  { %1082 = vmatpush1.msra.mxu0 %v2709_v18  ;;  %2262 = vmatpush3.msra.mxu1 %v2859_v60  ;;  %v3765_v18 = vld [vmem:[#allocation17_spill] sm:$0xff] }
 0x245   :  { %1083 = vmatprep.subr.mxu0 %v2712_v19  ;;  %2263 = vmatprep.subr.mxu1 %v3749_v53  ;;  %v3766_v19 = vld [vmem:[#allocation20_spill] sm:$0xff] }
 0x246   :  { %1084 = vmatpush1.msra.mxu0 %v2716_v20  ;;  %2264 = vmatpush3.msra.mxu1 %v2868_v62  ;;  %v3767_v20 = vld [vmem:[#allocation13_spill] sm:$0xff] }
 0x247   :  { %1085 = vmatprep.subr.mxu0 %v2723_v23  ;;  %2265 = vmatprep.subr.mxu1 %v3749_v53 }
 0x248   :  { %1086 = vmatpush1.msra.mxu0 %v2726_v24  ;;  %2266 = vmatpush3.msra.mxu1 %v2877_v1 }
 0x249   :  { %1087 = vmatprep.subr.mxu0 %v2729_v25  ;;  %2267 = vmatprep.subr.mxu1 %v3749_v53  ;;  %v3768_v25 = vld [vmem:[#allocation39_spill] sm:$0xff] }
 0x24a   :  { %1088 = vmatpush1.msra.mxu0 %v2733_v26  ;;  %2268 = vmatpush3.msra.mxu1 %v2886_v3 }
 0x24b   :  { %1089 = vmatprep.subr.mxu0 %v2740_v29  ;;  %2269 = vmatprep.subr.mxu1 %v3749_v53 }
 0x24c   :  { %1090 = vmatpush1.msra.mxu0 %v2743_v30  ;;  %2270 = vmatpush3.msra.mxu1 %v2895_v5  ;;  %v3769_v30 = vld [vmem:[#allocation23_spill] sm:$0xff] }
 0x24d   :  { %1091 = vmatprep.subr.mxu0 %v2746_v31  ;;  %2271 = vmatprep.subr.mxu1 %v3749_v53 }
 0x24e   :  { %1092 = vmatpush1.msra.mxu0 %v2750_v32  ;;  %2272 = vmatpush3.msra.mxu1 %v2901_v6 }
 0x24f   :  { %1093 = vmatprep.subr.mxu0 %v2757_v34  ;;  %2273 = vmatprep.subr.mxu1 %v3749_v53 }
 0x250   :  { %1094 = vmatpush1.msra.mxu0 %v2760_v35  ;;  %2274 = vmatpush3.msra.mxu1 %v2908_v7 }
 0x251   :  { %1095 = vmatprep.subr.mxu0 %v2764_v36  ;;  %2275 = vmatprep.subr.mxu1 %v3749_v53  ;;  %v3770_v36 = vld [vmem:[#allocation24_spill] sm:$0xff] }
 0x252   :  { %1096 = vmatpush1.msra.mxu0 %v2771_v38  ;;  %2276 = vmatpush3.msra.mxu1 %v2914_v8 }
 0x253   :  { %1097 = vmatprep.subr.mxu0 %v2778_v40  ;;  %2277 = vmatprep.subr.mxu1 %v3749_v53 }
 0x254   :  { %1098 = vmatpush1.msra.mxu0 %v2781_v41  ;;  %2278 = vmatpush3.msra.mxu1 %v2920_v9 }
 0x255   :  { %1099 = vmatprep.subr.mxu0 %v2784_v42  ;;  %2279 = vmatprep.subr.mxu1 %v3749_v53 }
 0x256   :  { %1100 = vmatpush1.msra.mxu0 %v2788_v43  ;;  %2280 = vmatpush3.msra.mxu1 %v2926_v12 }
 0x257   :  { %1101 = vmatprep.subr.mxu0 %v2795_v45  ;;  %2281 = vmatprep.subr.mxu1 %v3749_v53 }
 0x258   :  { %1102 = vmatpush1.msra.mxu0 %v2799_v46  ;;  %2282 = vmatpush3.msra.mxu1 %v2932_v15 }
 0x259   :  { %1103 = vmatprep.subr.mxu0 %v2803_v47  ;;  %2283 = vmatprep.subr.mxu1 %v3749_v53 }
 0x25a   :  { %1104 = vmatpush1.msra.mxu0 %v2807_v48  ;;  %2284 = vmatpush3.msra.mxu1 %v3750_v0 }
 0x25b   :  { %1105 = vmatprep.subr.mxu0 %v3761_v11  ;;  %2285 = vmatprep.subr.mxu1 %v3749_v53 }
 0x25c   :  { %1106 = vmatpush1.msra.mxu0 %v3762_v13  ;;  %2286 = vmatpush3.msra.mxu1 %v3763_v14 }
 0x25d   :  { %1107 = vmatprep.subr.mxu0 %v3764_v17  ;;  %2287 = vmatprep.subr.mxu1 %v3749_v53 }
 0x25e   :  { %1108 = vmatpush1.msra.mxu0 %v3765_v18  ;;  %1141 = vmatprep.mubr.f32.mxu0 %v3749_v53 }
 0x25f   :  { %2288 = vmatpush3.msra.mxu1 %v3766_v19  ;;  %2289 = vmatprep.mubr.msk.f32.mxu1 %vm2638_vm3, %v3749_v53 }
 0x260   :  { %1243 = vmatprep.subr.mxu0 %v3767_v20  ;;  %2292 = vmatprep.subr.mxu1 %v3749_v53  ;;  %v3265_v20 = vld [vmem:[#allocation7 + $0x150] sm:$0xff] }
 0x2ff   :  { %v977_v23 = vpop.f32.mrf.mxu0  ;;  %v1048_v24 = vpop.f32.mrf.mxu1 }
 0x300   :  { %v978_v26 = vadd.f32 %v977_v23, %v3768_v25  ;;  %v1049_v37 = vadd.f32 %v1048_v24, %v3089_v57  ;;  %v3273_v23 = vld [vmem:[#allocation7 + $0x138] sm:$0xff]  ;;  %v3281_v24 = vld [vmem:[#allocation7 + $0x120] sm:$0xff] }
 0x301   :  { %v2256_v29 = vpop.f32.mrf.mxu1  ;;  %v979_v32 = vpop.f32.mrf.mxu0 }
 0x302   :  { %v1052_v31 = vadd.f32 %v978_v26, %v3769_v30  ;;  %v980_v35 = vadd.f32 %v979_v32, %v3070_v4  ;;  %v3289_v26 = vld [vmem:[#allocation7 + $0x108] sm:$0xff]  ;;  %v3297_v29 = vld [vmem:[#allocation7 + $0xf0] sm:$0xff]  ;;  %v3305_v30 = vld [vmem:[#allocation7 + $0xd8] sm:$0xff] }
 0x303   :  { %v3321_v32 = vld [vmem:[#allocation7 + $0xa8] sm:$0xff] }
 0x304   :  { %v1949_v34 = vmul.f32 -1.442695, %v1052_v31  ;;  %v1059_v38 = vadd.f32 %v980_v35, %v3770_v36  ;;  %v3313_v31 = vld [vmem:[#allocation7 + $0xc0] sm:$0xff] }
 0x306   :  { %2459 = vpow2.f32 %v1949_v34  ;;  %v1950_v52 = vmul.f32 -1.442695, %v1059_v38  ;;  %v3329_v34 = vld [vmem:[#allocation7 + $0x90] sm:$0xff] }
 0x308   :  { %2461 = vpow2.f32 %v1950_v52 }
 0x313   :  { %v2460_v33 = vpop.eup %2459 }
 0x314   :  { %v1056_v51 = vadd.f32 1.0, %v2460_v33 }
 0x315   :  { %v2462_v63 = vpop.eup %2461 }
 0x316   :  { %2463 = vrcp.f32 %v1056_v51  ;;  %v1063_v55 = vadd.f32 1.0, %v2462_v63 }
 0x318   :  { %2465 = vrcp.f32 %v1063_v55  ;;  %v3775_v55 = vld [vmem:[#allocation32_spill] sm:$0xff] }
 0x323   :  { %v2464_v16 = vpop.eup %2463 }
 0x324   :  { %v1066_v49 = vmul.f32 %v2464_v16, %v1049_v37 }
 0x325   :  { %v2466_v28 = vpop.eup %2465 }
 0x326   :  { %v1067_v44 = vadd.f32 %v1066_v49, %v3771_v59  ;;  %v1069_v22 = vmul.f32 %v2466_v28, %v3772_v61 }
 0x328   :  { %2467 = vtanh.f32 %v1067_v44  ;;  %v3776_v44 = vld [vmem:[#allocation43_spill] sm:$0xff] }
 0x335   :  { %v2468_v21 = vpop.eup %2467 }
 0x336   :  { %v1070_v39 = vsub.f32 %v3173_v27, %v2468_v21 }
 0x338   :  { %v1071_v2 = vmul.f32 %v1070_v39, %v1069_v22  ;;  %v3378_v39 = vld [vmem:[#allocation7 + $0x178] sm:$0xff] }
 0x33a   :  { %v3253_v50 = vsub.f32 %v3173_v27, %v1071_v2  ;;  %v3269_v27 = vld [vmem:[#allocation7 + $0x140] sm:$0xff] }
 0x33b   :  { %v3384_v2 = vld [vmem:[#allocation7 + $0x160] sm:$0xff] }
 0x33c   :  { %1142 = vmatmul.mubr.f32.vlgmr.msra.gmra.mxu0 %v3253_v50  ;;  %2290 = vmatmul.mubr.f32.vlgmr.msra.gmra.mxu1 %v3253_v50 }
 0x33d   :  { %1244 = vmatpush1.msra.mxu0 %v3257_v54  ;;  %2293 = vmatpush3.msra.mxu1 %v2842_v56  ;;  %v3277_v56 = vld [vmem:[#allocation7 + $0x128] sm:$0xff] }
 0x33e   :  { %1245 = vmatprep.subr.mxu0 %v3261_v10  ;;  %2294 = vmatprep.subr.mxu1 %v3749_v53 }
 0x33f   :  { %1246 = vmatpush1.msra.mxu0 %v3265_v20  ;;  %2295 = vmatpush3.msra.mxu1 %v2850_v58  ;;  %v3285_v58 = vld [vmem:[#allocation7 + $0x110] sm:$0xff] }
 0x340   :  { %1247 = vmatprep.subr.mxu0 %v3269_v27  ;;  %2296 = vmatprep.subr.mxu1 %v3749_v53 }
 0x341   :  { %1248 = vmatpush1.msra.mxu0 %v3273_v23  ;;  %2297 = vmatpush3.msra.mxu1 %v2859_v60  ;;  %v3293_v60 = vld [vmem:[#allocation7 + $0xf8] sm:$0xff] }
 0x342   :  { %1249 = vmatprep.subr.mxu0 %v3277_v56  ;;  %2298 = vmatprep.subr.mxu1 %v3749_v53 }
 0x343   :  { %1250 = vmatpush1.msra.mxu0 %v3281_v24  ;;  %2299 = vmatpush3.msra.mxu1 %v2868_v62  ;;  %v3301_v62 = vld [vmem:[#allocation7 + $0xe0] sm:$0xff] }
 0x344   :  { %1251 = vmatprep.subr.mxu0 %v3285_v58  ;;  %2300 = vmatprep.subr.mxu1 %v3749_v53 }
 0x345   :  { %1252 = vmatpush1.msra.mxu0 %v3289_v26  ;;  %2301 = vmatpush3.msra.mxu1 %v2877_v1  ;;  %v3309_v1 = vld [vmem:[#allocation7 + $0xc8] sm:$0xff] }
 0x346   :  { %1253 = vmatprep.subr.mxu0 %v3293_v60  ;;  %2302 = vmatprep.subr.mxu1 %v3749_v53 }
 0x347   :  { %1254 = vmatpush1.msra.mxu0 %v3297_v29  ;;  %2303 = vmatpush3.msra.mxu1 %v2886_v3  ;;  %v3317_v3 = vld [vmem:[#allocation7 + $0xb0] sm:$0xff] }
 0x348   :  { %1255 = vmatprep.subr.mxu0 %v3301_v62  ;;  %2304 = vmatprep.subr.mxu1 %v3749_v53 }
 0x349   :  { %1256 = vmatpush1.msra.mxu0 %v3305_v30  ;;  %2305 = vmatpush3.msra.mxu1 %v2895_v5  ;;  %v3325_v5 = vld [vmem:[#allocation7 + $0x98] sm:$0xff] }
 0x34a   :  { %1257 = vmatprep.subr.mxu0 %v3309_v1  ;;  %2306 = vmatprep.subr.mxu1 %v3749_v53 }
 0x34b   :  { %1258 = vmatpush1.msra.mxu0 %v3313_v31  ;;  %2307 = vmatpush3.msra.mxu1 %v2901_v6 }
 0x34c   :  { %1259 = vmatprep.subr.mxu0 %v3317_v3  ;;  %2308 = vmatprep.subr.mxu1 %v3749_v53 }
 0x34d   :  { %1260 = vmatpush1.msra.mxu0 %v3321_v32  ;;  %2309 = vmatpush3.msra.mxu1 %v2908_v7 }
 0x34e   :  { %1261 = vmatprep.subr.mxu0 %v3325_v5  ;;  %2310 = vmatprep.subr.mxu1 %v3749_v53 }
 0x34f   :  { %1262 = vmatpush1.msra.mxu0 %v3329_v34  ;;  %2311 = vmatpush3.msra.mxu1 %v2914_v8 }
 0x350   :  { %1263 = vmatprep.subr.mxu0 %v2778_v40  ;;  %2312 = vmatprep.subr.mxu1 %v3749_v53  ;;  %v3360_v40 = vld [vmem:[#allocation7 + $0x170] sm:$0xff] }
 0x351   :  { %1264 = vmatpush1.msra.mxu0 %v2781_v41  ;;  %2313 = vmatpush3.msra.mxu1 %v2920_v9 }
 0x352   :  { %1265 = vmatprep.subr.mxu0 %v2784_v42  ;;  %2314 = vmatprep.subr.mxu1 %v3749_v53 }
 0x353   :  { %1266 = vmatpush1.msra.mxu0 %v2788_v43  ;;  %2315 = vmatpush3.msra.mxu1 %v2926_v12 }
 0x354   :  { %1267 = vmatprep.subr.mxu0 %v2795_v45  ;;  %2316 = vmatprep.subr.mxu1 %v3749_v53 }
 0x355   :  { %1268 = vmatpush1.msra.mxu0 %v2799_v46  ;;  %2317 = vmatpush3.msra.mxu1 %v2932_v15  ;;  %v3773_v46 = vld [vmem:[#allocation25_spill] sm:$0xff] }
 0x356   :  { %1269 = vmatprep.subr.mxu0 %v2803_v47  ;;  %2318 = vmatprep.subr.mxu1 %v3749_v53 }
 0x357   :  { %1270 = vmatpush1.msra.mxu0 %v2807_v48  ;;  %2319 = vmatpush3.msra.mxu1 %v3750_v0 }
 0x358   :  { %1271 = vmatprep.subr.mxu0 %v3761_v11  ;;  %2320 = vmatprep.subr.mxu1 %v3749_v53 }
 0x359   :  { %1272 = vmatpush1.msra.mxu0 %v3762_v13  ;;  %2321 = vmatpush3.msra.mxu1 %v3763_v14 }
 0x35a   :  { %1273 = vmatprep.subr.mxu0 %v3764_v17  ;;  %2322 = vmatprep.subr.mxu1 %v3749_v53  ;;  %v3774_v17 = vld [vmem:[#allocation26_spill] sm:$0xff] }
 0x35b   :  { %1274 = vmatpush1.msra.mxu0 %v3765_v18  ;;  %1307 = vmatprep.mubr.f32.mxu0 %v3749_v53 }
 0x35c   :  { %2323 = vmatpush3.msra.mxu1 %v3766_v19  ;;  %2324 = vmatprep.mubr.msk.f32.mxu1 %vm2638_vm3, %v3749_v53 }
 0x35d   :  { %1409 = vmatprep.subr.mxu0 %v3360_v40  ;;  %2327 = vmatprep.subr.mxu1 %v3749_v53 }
 0x3fc   :  { %v1143_v41 = vpop.f32.mrf.mxu0  ;;  %v1214_v42 = vpop.f32.mrf.mxu1 }
 0x3fd   :  { %v1144_v43 = vadd.f32 %v1143_v41, %v3768_v25  ;;  %v1215_v33 = vadd.f32 %v1214_v42, %v3089_v57  ;;  %v3396_v41 = vld [vmem:[#allocation7 + $0x130] sm:$0xff]  ;;  %v3402_v42 = vld [vmem:[#allocation7 + $0x118] sm:$0xff] }
 0x3fe   :  { %v2291_v45 = vpop.f32.mrf.mxu1  ;;  %v1145_v48 = vpop.f32.mrf.mxu0 }
 0x3ff   :  { %v1218_v47 = vadd.f32 %v1144_v43, %v3773_v46  ;;  %v1146_v13 = vadd.f32 %v1145_v48, %v3070_v4  ;;  %v3408_v43 = vld [vmem:[#allocation7 + $0x100] sm:$0xff]  ;;  %v3414_v45 = vld [vmem:[#allocation7 + $0xe8] sm:$0xff] }
 0x400   :  { %v3429_v46 = vld [vmem:[#allocation7 + $0x80] sm:$0xff]  ;;  %v3449_v48 = vld [vmem:[#allocation7 + $0x48] sm:$0xff] }
 0x401   :  { %v1951_v11 = vmul.f32 -1.442695, %v1218_v47  ;;  %v1225_v18 = vadd.f32 %v1146_v13, %v3774_v17  ;;  %v3441_v47 = vld [vmem:[#allocation7 + $0x60] sm:$0xff]  ;;  %v3465_v13 = vld [vmem:[#allocation7 + $0x18] sm:$0xff] }
 0x402   :  { %3777 = vst [vmem:[#allocation18_spill] sm:$0xff] %v3465_v13  ;;  %v3473_v17 = vld [vmem:[#allocation7] sm:$0xff] }
 0x403   :  { %2469 = vpow2.f32 %v1951_v11  ;;  %v1952_v35 = vmul.f32 -1.442695, %v1225_v18  ;;  %v3457_v11 = vld [vmem:[#allocation7 + $0x30] sm:$0xff]  ;;  %3779 = vst [vmem:[#allocation22_spill] sm:$0xff] %v3473_v17 }
 0x405   :  { %2471 = vpow2.f32 %v1952_v35 }
 0x410   :  { %v2470_v36 = vpop.eup %2469 }
 0x411   :  { %v1222_v38 = vadd.f32 1.0, %v2470_v36  ;;  %v3780_v36 = vld [vmem:[#allocation28_spill] sm:$0xff] }
 0x412   :  { %v2472_v52 = vpop.eup %2471 }
 0x413   :  { %2473 = vrcp.f32 %v1222_v38  ;;  %v1229_v51 = vadd.f32 1.0, %v2472_v52 }
 0x415   :  { %2475 = vrcp.f32 %v1229_v51 }
 0x420   :  { %v2474_v63 = vpop.eup %2473 }
 0x421   :  { %v1232_v37 = vmul.f32 %v2474_v63, %v1215_v33 }
 0x422   :  { %v2476_v49 = vpop.eup %2475 }
 0x423   :  { %v1233_v16 = vadd.f32 %v1232_v37, %v3775_v55  ;;  %v1235_v28 = vmul.f32 %v2476_v49, %v3776_v44 }
 0x425   :  { %2477 = vtanh.f32 %v1233_v16 }
 0x432   :  { %v2478_v59 = vpop.eup %2477 }
 0x433   :  { %v1236_v21 = vsub.f32 %v3253_v50, %v2478_v59 }
 0x435   :  { %v1237_v61 = vmul.f32 %v1236_v21, %v1235_v28 }
 0x437   :  { %v3373_v22 = vsub.f32 %v3253_v50, %v1237_v61  ;;  %v3390_v50 = vld [vmem:[#allocation7 + $0x148] sm:$0xff]  ;;  %v3782_v61 = vld [vmem:[#allocation38_spill] sm:$0xff] }
 0x439   :  { %1308 = vmatmul.mubr.f32.vlgmr.msra.gmra.mxu0 %v3373_v22  ;;  %2325 = vmatmul.mubr.f32.vlgmr.msra.gmra.mxu1 %v3373_v22 }
 0x43a   :  { %1410 = vmatpush1.msra.mxu0 %v3257_v54  ;;  %2328 = vmatpush3.msra.mxu1 %v3378_v39 }
 0x43b   :  { %1411 = vmatprep.subr.mxu0 %v3261_v10  ;;  %2329 = vmatprep.subr.mxu1 %v3749_v53 }
 0x43c   :  { %1412 = vmatpush1.msra.mxu0 %v3265_v20  ;;  %2330 = vmatpush3.msra.mxu1 %v3384_v2 }
 0x43d   :  { %1413 = vmatprep.subr.mxu0 %v3269_v27  ;;  %2331 = vmatprep.subr.mxu1 %v3749_v53 }
 0x43e   :  { %1414 = vmatpush1.msra.mxu0 %v3273_v23  ;;  %2332 = vmatpush3.msra.mxu1 %v3390_v50 }
 0x43f   :  { %1415 = vmatprep.subr.mxu0 %v3277_v56  ;;  %2333 = vmatprep.subr.mxu1 %v3749_v53 }
 0x440   :  { %1416 = vmatpush1.msra.mxu0 %v3281_v24  ;;  %2334 = vmatpush3.msra.mxu1 %v3396_v41 }
 0x441   :  { %1417 = vmatprep.subr.mxu0 %v3285_v58  ;;  %2335 = vmatprep.subr.mxu1 %v3749_v53 }
 0x442   :  { %1418 = vmatpush1.msra.mxu0 %v3289_v26  ;;  %2336 = vmatpush3.msra.mxu1 %v3402_v42 }
 0x443   :  { %1419 = vmatprep.subr.mxu0 %v3293_v60  ;;  %2337 = vmatprep.subr.mxu1 %v3749_v53 }
 0x444   :  { %1420 = vmatpush1.msra.mxu0 %v3297_v29  ;;  %2338 = vmatpush3.msra.mxu1 %v3408_v43 }
 0x445   :  { %1421 = vmatprep.subr.mxu0 %v3301_v62  ;;  %2339 = vmatprep.subr.mxu1 %v3749_v53 }
 0x446   :  { %1422 = vmatpush1.msra.mxu0 %v3305_v30  ;;  %2340 = vmatpush3.msra.mxu1 %v3414_v45 }
 0x447   :  { %1423 = vmatprep.subr.mxu0 %v3309_v1  ;;  %2341 = vmatprep.subr.mxu1 %v3749_v53 }
 0x448   :  { %1424 = vmatpush1.msra.mxu0 %v3313_v31  ;;  %2342 = vmatpush3.msra.mxu1 %v2901_v6  ;;  %v3433_v6 = vld [vmem:[#allocation7 + $0x78] sm:$0xff] }
 0x449   :  { %1425 = vmatprep.subr.mxu0 %v3317_v3  ;;  %2343 = vmatprep.subr.mxu1 %v3749_v53 }
 0x44a   :  { %1426 = vmatpush1.msra.mxu0 %v3321_v32  ;;  %2344 = vmatpush3.msra.mxu1 %v2908_v7  ;;  %v3437_v7 = vld [vmem:[#allocation7 + $0x68] sm:$0xff] }
 0x44b   :  { %1427 = vmatprep.subr.mxu0 %v3325_v5  ;;  %2345 = vmatprep.subr.mxu1 %v3749_v53 }
 0x44c   :  { %1428 = vmatpush1.msra.mxu0 %v3329_v34  ;;  %2346 = vmatpush3.msra.mxu1 %v2914_v8  ;;  %v3445_v8 = vld [vmem:[#allocation7 + $0x50] sm:$0xff] }
 0x44d   :  { %1429 = vmatprep.subr.mxu0 %v3429_v46  ;;  %2347 = vmatprep.subr.mxu1 %v3749_v53 }
 0x44e   :  { %1430 = vmatpush1.msra.mxu0 %v3433_v6  ;;  %2348 = vmatpush3.msra.mxu1 %v2920_v9  ;;  %v3453_v9 = vld [vmem:[#allocation7 + $0x38] sm:$0xff] }
 0x44f   :  { %1431 = vmatprep.subr.mxu0 %v3437_v7  ;;  %2349 = vmatprep.subr.mxu1 %v3749_v53 }
 0x450   :  { %1432 = vmatpush1.msra.mxu0 %v3441_v47  ;;  %2350 = vmatpush3.msra.mxu1 %v2926_v12  ;;  %v3461_v12 = vld [vmem:[#allocation7 + $0x20] sm:$0xff] }
 0x451   :  { %1433 = vmatprep.subr.mxu0 %v3445_v8  ;;  %2351 = vmatprep.subr.mxu1 %v3749_v53 }
 0x452   :  { %1434 = vmatpush1.msra.mxu0 %v3449_v48  ;;  %2352 = vmatpush3.msra.mxu1 %v2932_v15  ;;  %v3469_v15 = vld [vmem:[#allocation7 + $0x8] sm:$0xff] }
 0x453   :  { %1435 = vmatprep.subr.mxu0 %v3453_v9  ;;  %2353 = vmatprep.subr.mxu1 %v3749_v53  ;;  %3778 = vst [vmem:[#allocation21_spill] sm:$0xff] %v3469_v15 }
 0x454   :  { %1436 = vmatpush1.msra.mxu0 %v3457_v11  ;;  %2354 = vmatpush3.msra.mxu1 %v3750_v0 }
 0x455   :  { %1437 = vmatprep.subr.mxu0 %v3461_v12  ;;  %2355 = vmatprep.subr.mxu1 %v3749_v53 }
 0x456   :  { %1438 = vmatpush1.msra.mxu0 %v3465_v13  ;;  %2356 = vmatpush3.msra.mxu1 %v3763_v14 }
 0x457   :  { %1439 = vmatprep.subr.mxu0 %v3469_v15  ;;  %2357 = vmatprep.subr.mxu1 %v3749_v53 }
 0x458   :  { %1440 = vmatpush1.msra.mxu0 %v3473_v17  ;;  %1473 = vmatprep.mubr.f32.mxu0 %v3749_v53 }
 0x459   :  { %2358 = vmatpush3.msra.mxu1 %v3766_v19  ;;  %2359 = vmatprep.mubr.msk.f32.mxu1 %vm2638_vm3, %v3749_v53  ;;  %v3781_v19 = vld [vmem:[#allocation29_spill] sm:$0xff] }
 0x45a   :  { %1575 = vmatprep.subr.mxu0 %v3360_v40  ;;  %2362 = vmatprep.subr.mxu1 %v3749_v53 }
 0x4f9   :  { %v1309_v0 = vpop.f32.mrf.mxu0  ;;  %v1380_v14 = vpop.f32.mrf.mxu1 }
 0x4fa   :  { %v1310_v18 = vadd.f32 %v1309_v0, %v3768_v25  ;;  %v1381_v59 = vadd.f32 %v1380_v14, %v3089_v57  ;;  %v3530_v14 = vld [vmem:[#allocation7 + $0xb8] sm:$0xff] }
 0x4fb   :  { %v2326_v35 = vpop.f32.mrf.mxu1  ;;  %v1311_v52 = vpop.f32.mrf.mxu0 }
 0x4fc   :  { %v1384_v38 = vadd.f32 %v1310_v18, %v3780_v36  ;;  %v1312_v51 = vadd.f32 %v1311_v52, %v3070_v4  ;;  %v3783_v36 = vld [vmem:[#allocation46_spill] sm:$0xff] }
 0x4fe   :  { %v1953_v33 = vmul.f32 -1.442695, %v1384_v38  ;;  %v1391_v63 = vadd.f32 %v1312_v51, %v3781_v19  ;;  %v3536_v19 = vld [vmem:[#allocation7 + $0xa0] sm:$0xff] }
 0x500   :  { %2479 = vpow2.f32 %v1953_v33  ;;  %v1954_v37 = vmul.f32 -1.442695, %v1391_v63  ;;  %v3542_v63 = vld [vmem:[#allocation7 + $0x88] sm:$0xff] }
 0x502   :  { %2481 = vpow2.f32 %v1954_v37  ;;  %v3548_v37 = vld [vmem:[#allocation7 + $0x70] sm:$0xff] }
 0x50d   :  { %v2480_v55 = vpop.eup %2479 }
 0x50e   :  { %v1388_v16 = vadd.f32 1.0, %v2480_v55  ;;  %v3554_v55 = vld [vmem:[#allocation7 + $0x58] sm:$0xff] }
 0x50f   :  { %v2482_v49 = vpop.eup %2481 }
 0x510   :  { %2483 = vrcp.f32 %v1388_v16  ;;  %v1395_v44 = vadd.f32 1.0, %v2482_v49  ;;  %v3560_v16 = vld [vmem:[#allocation7 + $0x40] sm:$0xff]  ;;  %v3566_v49 = vld [vmem:[#allocation7 + $0x28] sm:$0xff] }
 0x511   :  { %3784 = vst [vmem:[#allocation27_spill] sm:$0xff] %v3566_v49 }
 0x512   :  { %2485 = vrcp.f32 %v1395_v44 }
 0x51d   :  { %v2484_v28 = vpop.eup %2483 }
 0x51e   :  { %v1398_v21 = vmul.f32 %v2484_v28, %v1381_v59  ;;  %v3573_v59 = vld [vmem:[#allocation7 + $0x10] sm:$0xff] }
 0x51f   :  { %v2486_v18 = vpop.eup %2485  ;;  %3785 = vst [vmem:[#allocation14_spill] sm:$0xff] %v3573_v59 }
 0x520   :  { %v1399_v0 = vadd.f32 %v1398_v21, %v3782_v61  ;;  %v1401_v38 = vmul.f32 %v2486_v18, %v3783_v36 }
 0x522   :  { %2487 = vtanh.f32 %v1399_v0  ;;  %v3786_v0 = vld [vmem:[#allocation30_spill] sm:$0xff] }
 0x52f   :  { %v2488_v35 = vpop.eup %2487 }
 0x530   :  { %v1402_v52 = vsub.f32 %v3373_v22, %v2488_v35 }
 0x532   :  { %v1403_v33 = vmul.f32 %v1402_v52, %v1401_v38  ;;  %v3787_v52 = vld [vmem:[#allocation31_spill] sm:$0xff] }
 0x534   :  { %v3491_v51 = vsub.f32 %v3373_v22, %v1403_v33  ;;  %v3524_v22 = vld [vmem:[#allocation7 + $0xd0] sm:$0xff] }
 0x536   :  { %1474 = vmatmul.mubr.f32.vlgmr.msra.gmra.mxu0 %v3491_v51  ;;  %2360 = vmatmul.mubr.f32.vlgmr.msra.gmra.mxu1 %v3491_v51 }
 0x537   :  { %1576 = vmatpush1.msra.mxu0 %v3257_v54  ;;  %2363 = vmatpush3.msra.mxu1 %v3378_v39 }
 0x538   :  { %1577 = vmatprep.subr.mxu0 %v3261_v10  ;;  %2364 = vmatprep.subr.mxu1 %v3749_v53 }
 0x539   :  { %1578 = vmatpush1.msra.mxu0 %v3265_v20  ;;  %2365 = vmatpush3.msra.mxu1 %v3384_v2 }
 0x53a   :  { %1579 = vmatprep.subr.mxu0 %v3269_v27  ;;  %2366 = vmatprep.subr.mxu1 %v3749_v53 }
 0x53b   :  { %1580 = vmatpush1.msra.mxu0 %v3273_v23  ;;  %2367 = vmatpush3.msra.mxu1 %v3390_v50 }
 0x53c   :  { %1581 = vmatprep.subr.mxu0 %v3277_v56  ;;  %2368 = vmatprep.subr.mxu1 %v3749_v53 }
 0x53d   :  { %1582 = vmatpush1.msra.mxu0 %v3281_v24  ;;  %2369 = vmatpush3.msra.mxu1 %v3396_v41 }
 0x53e   :  { %1583 = vmatprep.subr.mxu0 %v3285_v58  ;;  %2370 = vmatprep.subr.mxu1 %v3749_v53 }
 0x53f   :  { %1584 = vmatpush1.msra.mxu0 %v3289_v26  ;;  %2371 = vmatpush3.msra.mxu1 %v3402_v42 }
 0x540   :  { %1585 = vmatprep.subr.mxu0 %v3293_v60  ;;  %2372 = vmatprep.subr.mxu1 %v3749_v53 }
 0x541   :  { %1586 = vmatpush1.msra.mxu0 %v3297_v29  ;;  %2373 = vmatpush3.msra.mxu1 %v3408_v43 }
 0x542   :  { %1587 = vmatprep.subr.mxu0 %v3301_v62  ;;  %2374 = vmatprep.subr.mxu1 %v3749_v53 }
 0x543   :  { %1588 = vmatpush1.msra.mxu0 %v3305_v30  ;;  %2375 = vmatpush3.msra.mxu1 %v3414_v45 }
 0x544   :  { %1589 = vmatprep.subr.mxu0 %v3309_v1  ;;  %2376 = vmatprep.subr.mxu1 %v3749_v53 }
 0x545   :  { %1590 = vmatpush1.msra.mxu0 %v3313_v31  ;;  %2377 = vmatpush3.msra.mxu1 %v3524_v22 }
 0x546   :  { %1591 = vmatprep.subr.mxu0 %v3317_v3  ;;  %2378 = vmatprep.subr.mxu1 %v3749_v53 }
 0x547   :  { %1592 = vmatpush1.msra.mxu0 %v3321_v32  ;;  %2379 = vmatpush3.msra.mxu1 %v3530_v14 }
 0x548   :  { %1593 = vmatprep.subr.mxu0 %v3325_v5  ;;  %2380 = vmatprep.subr.mxu1 %v3749_v53 }
 0x549   :  { %1594 = vmatpush1.msra.mxu0 %v3329_v34  ;;  %2381 = vmatpush3.msra.mxu1 %v3536_v19 }
 0x54a   :  { %1595 = vmatprep.subr.mxu0 %v3429_v46  ;;  %2382 = vmatprep.subr.mxu1 %v3749_v53 }
 0x54b   :  { %1596 = vmatpush1.msra.mxu0 %v3433_v6  ;;  %2383 = vmatpush3.msra.mxu1 %v3542_v63 }
 0x54c   :  { %1597 = vmatprep.subr.mxu0 %v3437_v7  ;;  %2384 = vmatprep.subr.mxu1 %v3749_v53 }
 0x54d   :  { %1598 = vmatpush1.msra.mxu0 %v3441_v47  ;;  %2385 = vmatpush3.msra.mxu1 %v3548_v37 }
 0x54e   :  { %1599 = vmatprep.subr.mxu0 %v3445_v8  ;;  %2386 = vmatprep.subr.mxu1 %v3749_v53 }
 0x54f   :  { %1600 = vmatpush1.msra.mxu0 %v3449_v48  ;;  %2387 = vmatpush3.msra.mxu1 %v3554_v55 }
 0x550   :  { %1601 = vmatprep.subr.mxu0 %v3453_v9  ;;  %2388 = vmatprep.subr.mxu1 %v3749_v53 }
 0x551   :  { %1602 = vmatpush1.msra.mxu0 %v3457_v11  ;;  %2389 = vmatpush3.msra.mxu1 %v3560_v16 }
 0x552   :  { %1603 = vmatprep.subr.mxu0 %v3461_v12  ;;  %2390 = vmatprep.subr.mxu1 %v3749_v53 }
 0x553   :  { %1604 = vmatpush1.msra.mxu0 %v3465_v13  ;;  %2391 = vmatpush3.msra.mxu1 %v3566_v49 }
 0x554   :  { %1605 = vmatprep.subr.mxu0 %v3469_v15  ;;  %2392 = vmatprep.subr.mxu1 %v3749_v53 }
 0x555   :  { %1606 = vmatpush1.msra.mxu0 %v3473_v17  ;;  %1639 = vmatprep.mubr.f32.mxu0 %v3749_v53 }
 0x556   :  { %2393 = vmatpush3.msra.mxu1 %v3573_v59  ;;  %2394 = vmatprep.mubr.msk.f32.mxu1 %vm2638_vm3, %v3749_v53 }
 0x557   :  { %1741 = vmatprep.subr.mxu0 %v3360_v40  ;;  %2397 = vmatprep.subr.mxu1 %v3749_v53 }
 0x5f6   :  { %v1475_v44 = vpop.f32.mrf.mxu0  ;;  %v1546_v28 = vpop.f32.mrf.mxu1 }
 0x5f7   :  { %v1476_v21 = vadd.f32 %v1475_v44, %v3768_v25  ;;  %v1547_v49 = vadd.f32 %v1546_v28, %v3089_v57  ;;  %v3788_v25 = vld [vmem:[#allocation36_spill] sm:$0xff] }
 0x5f8   :  { %v2361_v61 = vpop.f32.mrf.mxu1  ;;  %v1477_v35 = vpop.f32.mrf.mxu0 }
 0x5f9   :  { %v1550_v18 = vadd.f32 %v1476_v21, %v3786_v0  ;;  %v1478_v38 = vadd.f32 %v1477_v35, %v3070_v4  ;;  %v3789_v35 = vld [vmem:[#allocation45_spill] sm:$0xff] }
 0x5fb   :  { %v1955_v36 = vmul.f32 -1.442695, %v1550_v18  ;;  %v1557_v33 = vadd.f32 %v1478_v38, %v3787_v52 }
 0x5fd   :  { %2489 = vpow2.f32 %v1955_v36  ;;  %v1956_v59 = vmul.f32 -1.442695, %v1557_v33 }
 0x5ff   :  { %2491 = vpow2.f32 %v1956_v59 }
 0x60a   :  { %v2490_v17 = vpop.eup %2489 }
 0x60b   :  { %v1554_v40 = vadd.f32 1.0, %v2490_v17 }
 0x60c   :  { %v2492_v15 = vpop.eup %2491 }
 0x60d   :  { %2493 = vrcp.f32 %v1554_v40  ;;  %v1561_v13 = vadd.f32 1.0, %v2492_v15  ;;  %v3800_v15 = vld [vmem:[#allocation37_spill] sm:$0xff] }
 0x60f   :  { %2495 = vrcp.f32 %v1561_v13 }
 0x61a   :  { %v2494_v44 = vpop.eup %2493 }
 0x61b   :  { %v1564_v61 = vmul.f32 %v2494_v44, %v1547_v49 }
 0x61c   :  { %v2496_v0 = vpop.eup %2495 }
 0x61d   :  { %v1565_v21 = vadd.f32 %v1564_v61, %v3788_v25  ;;  %v1567_v36 = vmul.f32 %v2496_v0, %v3789_v35  ;;  %v3790_v25 = vld [vmem:[#allocation18_spill] sm:$0xff]  ;;  %v3802_v61 = vld [vmem:[#allocation41_spill] sm:$0xff] }
 0x61f   :  { %2497 = vtanh.f32 %v1565_v21 }
 0x62c   :  { %v2498_v18 = vpop.eup %2497 }
 0x62d   :  { %v1568_v38 = vsub.f32 %v3491_v51, %v2498_v18 }
 0x62f   :  { %v1569_v59 = vmul.f32 %v1568_v38, %v1567_v36 }
 0x631   :  { %v3589_v17 = vsub.f32 %v3491_v51, %v1569_v59 }
 0x633   :  { %1640 = vmatmul.mubr.f32.vlgmr.msra.gmra.mxu0 %v3589_v17  ;;  %2395 = vmatmul.mubr.f32.vlgmr.msra.gmra.mxu1 %v3589_v17 }
 0x634   :  { %1742 = vmatpush1.msra.mxu0 %v3257_v54  ;;  %2398 = vmatpush3.msra.mxu1 %v3378_v39  ;;  %v3791_v54 = vld [vmem:[#allocation27_spill] sm:$0xff] }
 0x635   :  { %1743 = vmatprep.subr.mxu0 %v3261_v10  ;;  %2399 = vmatprep.subr.mxu1 %v3749_v53  ;;  %v3792_v10 = vld [vmem:[#allocation21_spill] sm:$0xff] }
 0x636   :  { %1744 = vmatpush1.msra.mxu0 %v3265_v20  ;;  %2400 = vmatpush3.msra.mxu1 %v3384_v2  ;;  %v3793_v20 = vld [vmem:[#allocation22_spill] sm:$0xff] }
 0x637   :  { %1745 = vmatprep.subr.mxu0 %v3269_v27  ;;  %2401 = vmatprep.subr.mxu1 %v3749_v53  ;;  %v3794_v27 = vld [vmem:[#allocation14_spill] sm:$0xff] }
 0x638   :  { %1746 = vmatpush1.msra.mxu0 %v3273_v23  ;;  %2402 = vmatpush3.msra.mxu1 %v3390_v50 }
 0x639   :  { %1747 = vmatprep.subr.mxu0 %v3277_v56  ;;  %2403 = vmatprep.subr.mxu1 %v3749_v53 }
 0x63a   :  { %1748 = vmatpush1.msra.mxu0 %v3281_v24  ;;  %2404 = vmatpush3.msra.mxu1 %v3396_v41  ;;  %v3795_v24 = vld [vmem:[#allocation39_spill] sm:$0xff] }
 0x63b   :  { %1749 = vmatprep.subr.mxu0 %v3285_v58  ;;  %2405 = vmatprep.subr.mxu1 %v3749_v53 }
 0x63c   :  { %1750 = vmatpush1.msra.mxu0 %v3289_v26  ;;  %2406 = vmatpush3.msra.mxu1 %v3402_v42  ;;  %v3798_v42 = vld [vmem:[#allocation42_spill] sm:$0xff] }
 0x63d   :  { %1751 = vmatprep.subr.mxu0 %v3293_v60  ;;  %2407 = vmatprep.subr.mxu1 %v3749_v53  ;;  %v3796_v60 = vld [vmem:[#allocation33_spill] sm:$0xff] }
 0x63e   :  { %1752 = vmatpush1.msra.mxu0 %v3297_v29  ;;  %2408 = vmatpush3.msra.mxu1 %v3408_v43 }
 0x63f   :  { %1753 = vmatprep.subr.mxu0 %v3301_v62  ;;  %2409 = vmatprep.subr.mxu1 %v3749_v53 }
 0x640   :  { %1754 = vmatpush1.msra.mxu0 %v3305_v30  ;;  %2410 = vmatpush3.msra.mxu1 %v3414_v45 }
 0x641   :  { %1755 = vmatprep.subr.mxu0 %v3309_v1  ;;  %2411 = vmatprep.subr.mxu1 %v3749_v53 }
 0x642   :  { %1756 = vmatpush1.msra.mxu0 %v3313_v31  ;;  %2412 = vmatpush3.msra.mxu1 %v3524_v22  ;;  %v3797_v31 = vld [vmem:[#allocation35_spill] sm:$0xff] }
 0x643   :  { %1757 = vmatprep.subr.mxu0 %v3317_v3  ;;  %2413 = vmatprep.subr.mxu1 %v3749_v53 }
 0x644   :  { %1758 = vmatpush1.msra.mxu0 %v3321_v32  ;;  %2414 = vmatpush3.msra.mxu1 %v3530_v14 }
 0x645   :  { %1759 = vmatprep.subr.mxu0 %v3325_v5  ;;  %2415 = vmatprep.subr.mxu1 %v3749_v53 }
 0x646   :  { %1760 = vmatpush1.msra.mxu0 %v3329_v34  ;;  %2416 = vmatpush3.msra.mxu1 %v3536_v19 }
 0x647   :  { %1761 = vmatprep.subr.mxu0 %v3429_v46  ;;  %2417 = vmatprep.subr.mxu1 %v3749_v53 }
 0x648   :  { %1762 = vmatpush1.msra.mxu0 %v3433_v6  ;;  %2418 = vmatpush3.msra.mxu1 %v3542_v63  ;;  %v3799_v6 = vld [vmem:[#allocation48_spill] sm:$0xff] }
 0x649   :  { %1763 = vmatprep.subr.mxu0 %v3437_v7  ;;  %2419 = vmatprep.subr.mxu1 %v3749_v53  ;;  %v3801_v63 = vld [vmem:[#allocation40_spill] sm:$0xff] }
 0x64a   :  { %1764 = vmatpush1.msra.mxu0 %v3441_v47  ;;  %2420 = vmatpush3.msra.mxu1 %v3548_v37 }
 0x64b   :  { %1765 = vmatprep.subr.mxu0 %v3445_v8  ;;  %2421 = vmatprep.subr.mxu1 %v3749_v53 }
 0x64c   :  { %1766 = vmatpush1.msra.mxu0 %v3449_v48  ;;  %2422 = vmatpush3.msra.mxu1 %v3554_v55 }
 0x64d   :  { %1767 = vmatprep.subr.mxu0 %v3453_v9  ;;  %2423 = vmatprep.subr.mxu1 %v3749_v53 }
 0x64e   :  { %1768 = vmatpush1.msra.mxu0 %v3457_v11  ;;  %2424 = vmatpush3.msra.mxu1 %v3560_v16 }
 0x64f   :  { %1769 = vmatprep.subr.mxu0 %v3461_v12  ;;  %2425 = vmatprep.subr.mxu1 %v3749_v53 }
 0x650   :  { %1770 = vmatpush1.msra.mxu0 %v3790_v25  ;;  %2426 = vmatpush3.msra.mxu1 %v3791_v54 }
 0x651   :  { %1771 = vmatprep.subr.mxu0 %v3792_v10  ;;  %2427 = vmatprep.subr.mxu1 %v3749_v53 }
 0x652   :  { %1772 = vmatpush1.msra.mxu0 %v3793_v20  ;;  %1805 = vmatprep.mubr.f32.mxu0 %v3749_v53 }
 0x653   :  { %2428 = vmatpush3.msra.mxu1 %v3794_v27  ;;  %2429 = vmatprep.mubr.msk.f32.mxu1 %vm2638_vm3, %v3749_v53 }
 0x6f3   :  { %v1641_v23 = vpop.f32.mrf.mxu0  ;;  %v1712_v56 = vpop.f32.mrf.mxu1 }
 0x6f4   :  { %v1642_v58 = vadd.f32 %v1641_v23, %v3795_v24  ;;  %v1713_v39 = vadd.f32 %v1712_v56, %v3089_v57 }
 0x6f5   :  { %v2396_v26 = vpop.f32.mrf.mxu1  ;;  %v1643_v62 = vpop.f32.mrf.mxu0 }
 0x6f6   :  { %v1716_v29 = vadd.f32 %v1642_v58, %v3796_v60  ;;  %v1644_v1 = vadd.f32 %v1643_v62, %v3070_v4 }
 0x6f8   :  { %v1957_v30 = vmul.f32 -1.442695, %v1716_v29  ;;  %v1723_v3 = vadd.f32 %v1644_v1, %v3797_v31 }
 0x6fa   :  { %2499 = vpow2.f32 %v1957_v30  ;;  %v1958_v32 = vmul.f32 -1.442695, %v1723_v3 }
 0x6fc   :  { %2501 = vpow2.f32 %v1958_v32 }
 0x707   :  { %v2500_v5 = vpop.eup %2499 }
 0x708   :  { %v1720_v34 = vadd.f32 1.0, %v2500_v5 }
 0x709   :  { %v2502_v53 = vpop.eup %2501 }
 0x70a   :  { %2503 = vrcp.f32 %v1720_v34  ;;  %v1727_v2 = vadd.f32 1.0, %v2502_v53 }
 0x70c   :  { %2505 = vrcp.f32 %v1727_v2 }
 0x717   :  { %v2504_v50 = vpop.eup %2503 }
 0x718   :  { %v1730_v41 = vmul.f32 %v2504_v50, %v1713_v39 }
 0x719   :  { %v2506_v45 = vpop.eup %2505 }
 0x71a   :  { %v1731_v43 = vadd.f32 %v1730_v41, %v3798_v42  ;;  %v1733_v7 = vmul.f32 %v2506_v45, %v3799_v6 }
 0x71c   :  { %2507 = vtanh.f32 %v1731_v43 }
 0x729   :  { %v2508_v46 = vpop.eup %2507 }
 0x72a   :  { %v1734_v47 = vsub.f32 %v3589_v17, %v2508_v46 }
 0x72c   :  { %v1735_v8 = vmul.f32 %v1734_v47, %v1733_v7 }
 0x72e   :  { %v1736_v48 = vsub.f32 %v3589_v17, %v1735_v8 }
 0x730   :  { %1806 = vmatmul.mubr.f32.vlgmr.msra.gmra.mxu0 %v1736_v48  ;;  %2430 = vmatmul.mubr.f32.vlgmr.msra.gmra.mxu1 %v1736_v48 }
 0x7f0   :  { %v1807_v9 = vpop.f32.mrf.mxu0  ;;  %v1878_v11 = vpop.f32.mrf.mxu1 }
 0x7f1   :  { %v1808_v12 = vadd.f32 %v1807_v9, %v3795_v24  ;;  %v1879_v52 = vadd.f32 %v1878_v11, %v3089_v57 }
 0x7f2   :  { %v2431_v13 = vpop.f32.mrf.mxu1  ;;  %v1809_v22 = vpop.f32.mrf.mxu0 }
 0x7f3   :  { %v1882_v51 = vadd.f32 %v1808_v12, %v3800_v15  ;;  %v1810_v19 = vadd.f32 %v1809_v22, %v3070_v4  ;;  %v3803_v4 = vld [vmem:[#allocation47_spill] sm:$0xff] }
 0x7f5   :  { %v1959_v14 = vmul.f32 -1.442695, %v1882_v51  ;;  %v1889_v37 = vadd.f32 %v1810_v19, %v3801_v63 }
 0x7f7   :  { %2509 = vpow2.f32 %v1959_v14  ;;  %v1960_v55 = vmul.f32 -1.442695, %v1889_v37 }
 0x7f9   :  { %2511 = vpow2.f32 %v1960_v55 }
 0x804   :  { %v2510_v16 = vpop.eup %2509 }
 0x805   :  { %v1886_v49 = vadd.f32 1.0, %v2510_v16 }
 0x806   :  { %v2512_v28 = vpop.eup %2511 }
 0x807   :  { %2513 = vrcp.f32 %v1886_v49  ;;  %v1893_v33 = vadd.f32 1.0, %v2512_v28 }
 0x809   :  { %2515 = vrcp.f32 %v1893_v33 }
 0x814   :  { %v2514_v40 = vpop.eup %2513 }
 0x815   :  { %v1896_v44 = vmul.f32 %v2514_v40, %v1879_v52 }
 0x816   :  { %v2516_v0 = vpop.eup %2515 }
 0x817   :  { %v1897_v21 = vadd.f32 %v1896_v44, %v3802_v61  ;;  %v1899_v35 = vmul.f32 %v2516_v0, %v3803_v4 }
 0x819   :  { %2517 = vtanh.f32 %v1897_v21 }
 0x826   :  { %v2518_v18 = vpop.eup %2517 }
 0x827   :  { %v1900_v36 = vsub.f32 %v1736_v48, %v2518_v18 }
 0x829   :  { %v1901_v38 = vmul.f32 %v1900_v36, %v1899_v35 }
 0x82b   :  { %v1902_v59 = vsub.f32 %v1736_v48, %v1901_v38 }
 0x82d   :  { %1903 = vst [vmem:[#allocation9] sm:$0xff] %v1902_v59 }
 0x82e   :  { %2618 = shalt.err (!%p2615_p0)
}
 0x82f   :  { %1913 = dma.vmem_to_hbm [thread:$0]  %s1911_s20, 128, %s3684_s7, [#allocation6]  }
 0x830   :  { %2631 = dma.done.wait [#allocation6], 128  }
 0x831   :  { %2632 = vsyncadd [#allocation6], 4294967168 }
 0x832   :  { %1917 = vsyncpa [#allocation5], 1 }
 0x833   :  { %1918 = vsyncpa [#allocation8], 1 }
 0x834   :  { %1919 = vsyncpa [#allocation6], 1 }

</bundles_post_ra>
